<compile_context>
chip_gen: v6e
topology: v6e:2x2x1
jax: 0.10.0
libtpu: 0.0.40
codegen_flags: <defaults>
</compile_context>

<pallas_src>
import functools

import jax
import jax.numpy as jnp
from jax import lax
from jax.experimental import pallas as pl
from jax.experimental.pallas import tpu as pltpu

# ----------------------------- config (small) --------------------------------
B = 2            # batch (one sentence per grid step)
S = 8            # sequence length
H = 32           # real hidden size
NH = 2           # attention heads
HD = H // NH     # real head dim (16)
F = 64           # real FFN intermediate size
V = 100          # vocab size
L = 2            # encoder layers

HP = 128         # lane-padded hidden size
FP = 128         # lane-padded FFN size
VP = 128         # lane-padded vocab size (one-hot width)
PW = 128         # per-head lane group width (HD padded to a full vreg lane dim)
QW = NH * PW     # 256: width of the Q (or K or V) block inside fused QKV
QKVW = 3 * QW    # 768: fused QKV output width

WO_ROWS = QW                     # wo contraction dim = NH * 128 (head-aligned)
WREST_ROWS = WO_ROWS + HP + FP   # wo(256) + w1(128) + w2(128) stacked rows = 512

# f32 const slab layout (rows x 768):
#   rows 0:S          pos_emb            (cols 0:HP)
#   row  S            embedding LN gamma (cols 0:HP)
#   row  S+1          embedding LN beta  (cols 0:HP)
#   rows CL_BASE+8*l  per-layer: bqkv(768), bo, ln1_g, ln1_b, b1, b2, ln2_g, ln2_b
CL_BASE = 16
NC = CL_BASE + 8 * L             # 32 rows


# ----------------------------- in-kernel helpers ------------------------------
def _ln(x, g, b, vmask, inv_h, eps=1e-12):
    """LayerNorm over the REAL hidden columns (padding columns of x are exactly 0)."""
    mu = jnp.sum(x, axis=-1, keepdims=True) * inv_h          # padding cols are 0 already
    d = (x - mu) * vmask
    var = jnp.sum(d * d, axis=-1, keepdims=True) * inv_h
    return d * lax.rsqrt(var + eps) * g + b


# ------------------------------ fused forward kernel --------------------------
def sbert_fused_kernel(ids_ref, bias_ref, tokm_ref, wemb_ref, consts_ref,
                       wqkv_ref, wrest_ref, out_ref, *, pooling_type):
    # Hoisted invariants for this sentence.
    vmask = (lax.broadcasted_iota(jnp.int32, (S, HP), 1) < H).astype(jnp.float32)
    inv_h = 1.0 / float(H)
    bias = bias_ref[0]                      # (S, S): 0 = attend, -1e9 = padded key
    ids = ids_ref[0]                        # (S, 1) int32 token ids
    tm = tokm_ref[0]                        # (S, 1) f32 token mask

    # ---- embedding lookup fused as one-hot @ word_emb (single tiny MXU matmul) ----
    onehot = (lax.broadcasted_iota(jnp.int32, (S, VP), 1) == ids).astype(jnp.bfloat16)
    emb = jnp.dot(onehot, wemb_ref[...], preferred_element_type=jnp.float32)   # (S, HP)
    emb = emb + consts_ref[0:S, 0:HP]                                          # + pos_emb

    # Embedding LayerNorm.
    x = _ln(emb, consts_ref[S:S + 1, 0:HP], consts_ref[S + 1:S + 2, 0:HP], vmask, inv_h)

    for l in range(L):                      # static unroll; weights stay resident in VMEM
        base = CL_BASE + 8 * l
        bqkv = consts_ref[base:base + 1, :]            # (1, 768)
        bo = consts_ref[base + 1:base + 2, 0:HP]
        ln1g = consts_ref[base + 2:base + 3, 0:HP]
        ln1b = consts_ref[base + 3:base + 4, 0:HP]
        b1 = consts_ref[base + 4:base + 5, 0:FP]
        b2 = consts_ref[base + 5:base + 6, 0:HP]
        ln2g = consts_ref[base + 6:base + 7, 0:HP]
        ln2b = consts_ref[base + 7:base + 8, 0:HP]

        wqkv_l = wqkv_ref[l]                           # (HP, 768) bf16
        wo_l = wrest_ref[l, 0:WO_ROWS, :]              # (256, HP) bf16
        w1_l = wrest_ref[l, WO_ROWS:WO_ROWS + HP, :]   # (HP, FP)  bf16
        w2_l = wrest_ref[l, WO_ROWS + HP:WREST_ROWS, :]  # (FP, HP) bf16

        # ---- fused QKV projection (scale already folded into wq/bq) ----
        xb = x.astype(jnp.bfloat16)
        qkv = jnp.dot(xb, wqkv_l, preferred_element_type=jnp.float32) + bqkv   # (S, 768)

        # ---- attention: 128-lane-aligned head slices, bf16 MXU operands ----
        ctx_heads = []
        for h in range(NH):                 # static unroll over heads
            q_h = qkv[:, h * PW:(h + 1) * PW].astype(jnp.bfloat16)
            k_h = qkv[:, QW + h * PW:QW + (h + 1) * PW].astype(jnp.bfloat16)
            v_h = qkv[:, 2 * QW + h * PW:2 * QW + (h + 1) * PW].astype(jnp.bfloat16)
            s = lax.dot_general(q_h, k_h, (((1,), (1,)), ((), ())),
                                preferred_element_type=jnp.float32)            # (S, S)
            s = s + bias
            s = s - jnp.max(s, axis=-1, keepdims=True)
            p = jnp.exp(s)
            p = p * pl.reciprocal(jnp.sum(p, axis=-1, keepdims=True), approx=True)
            ctx_heads.append(jnp.dot(p.astype(jnp.bfloat16), v_h,
                                     preferred_element_type=jnp.float32))      # (S, 128)
        ctx = jnp.concatenate(ctx_heads, axis=-1)                              # (S, 256)

        # ---- single output projection over the concatenated (head-aligned) ctx ----
        attn = jnp.dot(ctx.astype(jnp.bfloat16), wo_l,
                       preferred_element_type=jnp.float32) + bo                # (S, HP)

        h1 = _ln(x + attn, ln1g, ln1b, vmask, inv_h)

        # ---- FFN (lane-dense) ----
        ff = jnp.dot(h1.astype(jnp.bfloat16), w1_l,
                     preferred_element_type=jnp.float32) + b1
        # TODO(synk): HF ELECTRA uses exact (erf) GELU; tanh approximation used here.
        ff = jax.nn.gelu(ff, approximate=True)
        ff = jnp.dot(ff.astype(jnp.bfloat16), w2_l,
                     preferred_element_type=jnp.float32) + b2

        x = _ln(h1 + ff, ln2g, ln2b, vmask, inv_h)

    # ---- pooling for this sentence (padded token rows dropped via tm) ----
    if pooling_type == "mean":
        summed = jnp.sum(x * tm, axis=0, keepdims=True)                        # (1, HP)
        cnt = jnp.maximum(jnp.sum(tm, keepdims=True), 1e-9)                    # clamp(1e-9)
        # approx reciprocal (~1e-4 rel err) is acceptable for sentence embeddings.
        row = summed * pl.reciprocal(cnt, approx=True)
    elif pooling_type == "max":
        row = jnp.max(jnp.where(tm > 0.0, x, -1.0e9), axis=0, keepdims=True)   # (1, HP)
    else:  # "cls"
        row = x[0:1, :]
    out_ref[0] = row


# ------------------------------ params / packing ------------------------------
def init_params(key):
    keys = iter(jax.random.split(key, 8 * L + 8))

    def nrm(shape):
        return 0.02 * jax.random.normal(next(keys), shape, jnp.float32)

    params = {
        "word_emb": nrm((V, H)),
        "pos_emb": nrm((S, H)),
        "emb_ln_g": jnp.ones((1, H), jnp.float32),
        "emb_ln_b": jnp.zeros((1, H), jnp.float32),
        "layers": [],
    }
    for _ in range(L):
        params["layers"].append({
            "wq": nrm((H, H)), "bq": jnp.zeros((1, H), jnp.float32),
            "wk": nrm((H, H)), "bk": jnp.zeros((1, H), jnp.float32),
            "wv": nrm((H, H)), "bv": jnp.zeros((1, H), jnp.float32),
            "wo": nrm((H, H)), "bo": jnp.zeros((1, H), jnp.float32),
            "ln1_g": jnp.ones((1, H), jnp.float32), "ln1_b": jnp.zeros((1, H), jnp.float32),
            "w1": nrm((H, F)), "b1": jnp.zeros((1, F), jnp.float32),
            "w2": nrm((F, H)), "b2": jnp.zeros((1, H), jnp.float32),
            "ln2_g": jnp.ones((1, H), jnp.float32), "ln2_b": jnp.zeros((1, H), jnp.float32),
        })
    return params


def pack_params(params):
    """Lane-dense, head-aligned, scale-folded packing into 4 kernel operands."""
    def pad2(a, rows, cols):
        return jnp.pad(a, ((0, rows - a.shape[0]), (0, cols - a.shape[1])))

    scale = 1.0 / (HD ** 0.5)

    consts = jnp.zeros((NC, QKVW), jnp.float32)
    consts = consts.at[0:S, 0:HP].set(pad2(params["pos_emb"], S, HP))
    consts = consts.at[S, 0:HP].set(pad2(params["emb_ln_g"], 1, HP)[0])
    consts = consts.at[S + 1, 0:HP].set(pad2(params["emb_ln_b"], 1, HP)[0])

    wqkv_list, wrest_list = [], []
    for li, lp in enumerate(params["layers"]):
        base = CL_BASE + 8 * li

        # Head-aligned fused QKV weight/bias; attention scale folded into wq/bq.
        wqkv = jnp.zeros((HP, QKVW), jnp.float32)
        bqkv = jnp.zeros((QKVW,), jnp.float32)
        for h in range(NH):
            cq, ck, cv = h * PW, QW + h * PW, 2 * QW + h * PW
            wqkv = wqkv.at[0:H, cq:cq + HD].set(lp["wq"][:, h * HD:(h + 1) * HD] * scale)
            wqkv = wqkv.at[0:H, ck:ck + HD].set(lp["wk"][:, h * HD:(h + 1) * HD])
            wqkv = wqkv.at[0:H, cv:cv + HD].set(lp["wv"][:, h * HD:(h + 1) * HD])
            bqkv = bqkv.at[cq:cq + HD].set(lp["bq"][0, h * HD:(h + 1) * HD] * scale)
            bqkv = bqkv.at[ck:ck + HD].set(lp["bk"][0, h * HD:(h + 1) * HD])
            bqkv = bqkv.at[cv:cv + HD].set(lp["bv"][0, h * HD:(h + 1) * HD])

        # Head-aligned wo: contraction rows grouped per 128-lane head block.
        wo = jnp.zeros((WO_ROWS, HP), jnp.float32)
        for h in range(NH):
            wo = wo.at[h * PW:h * PW + HD, 0:H].set(lp["wo"][h * HD:(h + 1) * HD, :])
        w1 = pad2(lp["w1"], HP, FP)
        w2 = pad2(lp["w2"], FP, HP)

        wqkv_list.append(wqkv)
        wrest_list.append(jnp.concatenate([wo, w1, w2], axis=0))   # (512, HP)

        consts = consts.at[base + 0, :].set(bqkv)
        consts = consts.at[base + 1, 0:HP].set(pad2(lp["bo"], 1, HP)[0])
        consts = consts.at[base + 2, 0:HP].set(pad2(lp["ln1_g"], 1, HP)[0])
        consts = consts.at[base + 3, 0:HP].set(pad2(lp["ln1_b"], 1, HP)[0])
        consts = consts.at[base + 4, 0:FP].set(pad2(lp["b1"], 1, FP)[0])
        consts = consts.at[base + 5, 0:HP].set(pad2(lp["b2"], 1, HP)[0])
        consts = consts.at[base + 6, 0:HP].set(pad2(lp["ln2_g"], 1, HP)[0])
        consts = consts.at[base + 7, 0:HP].set(pad2(lp["ln2_b"], 1, HP)[0])

    return {
        "word_emb": pad2(params["word_emb"], VP, HP).astype(jnp.bfloat16),   # (VP, HP)
        "consts": consts,                                                    # (NC, 768) f32
        "wqkv": jnp.stack(wqkv_list).astype(jnp.bfloat16),                   # (L, HP, 768)
        "wrest": jnp.stack(wrest_list).astype(jnp.bfloat16),                 # (L, 512, HP)
    }


# ----------------------------------- forward -----------------------------------
def sentence_bert_forward(packed, input_ids, attention_mask, pooling_type="mean"):
    if pooling_type not in ("mean", "max", "cls"):
        raise ValueError("'pooling_type' only ['mean','max','cls'] possible")

    ids = input_ids.reshape(B, S, 1).astype(jnp.int32)
    key_valid = attention_mask.astype(jnp.float32)                       # (B, S)
    bias = jnp.broadcast_to((1.0 - key_valid)[:, None, :] * -1.0e9, (B, S, S))
    tokm = attention_mask.reshape(B, S, 1).astype(jnp.float32)

    grid_spec = pltpu.PrefetchScalarGridSpec(
        num_scalar_prefetch=0,
        grid=(B,),                                                        # 1 sentence / step
        in_specs=[
            pl.BlockSpec((1, S, 1), lambda b: (b, 0, 0)),                 # token ids
            pl.BlockSpec((1, S, S), lambda b: (b, 0, 0)),                 # attention bias
            pl.BlockSpec((1, S, 1), lambda b: (b, 0, 0)),                 # token mask
            pl.BlockSpec((VP, HP), lambda b: (0, 0)),                     # word embedding
            pl.BlockSpec((NC, QKVW), lambda b: (0, 0)),                   # f32 const slab
            pl.BlockSpec((L, HP, QKVW), lambda b: (0, 0, 0)),             # bf16 QKV weights
            pl.BlockSpec((L, WREST_ROWS, HP), lambda b: (0, 0, 0)),       # bf16 wo/w1/w2
        ],
        out_specs=pl.BlockSpec((1, 1, HP), lambda b: (b, 0, 0)),
    )

    pooled = pl.pallas_call(
        functools.partial(sbert_fused_kernel, pooling_type=pooling_type),
        out_shape=jax.ShapeDtypeStruct((B, 1, HP), jnp.float32),
        grid_spec=grid_spec,
        compiler_params=pltpu.CompilerParams(
            dimension_semantics=("parallel",)),                           # both TCs on v7x
    )(ids, bias, tokm, packed["word_emb"], packed["consts"],
      packed["wqkv"], packed["wrest"])

    return {"sentence_embedding": pooled[:, 0, :H]}                       # strip lane padding


# ----------------------------------- main --------------------------------------
if __name__ == "__main__":
    key = jax.random.PRNGKey(0)
    pkey, ikey = jax.random.split(key)
    params = init_params(pkey)
    packed = pack_params(params)

    input_ids = jax.random.randint(ikey, (B, S), 0, V, dtype=jnp.int32)
    attention_mask = jnp.array([[1, 1, 1, 1, 1, 1, 1, 1],
                                [1, 1, 1, 1, 1, 0, 0, 0]], dtype=jnp.int32)

    out = sentence_bert_forward(packed, input_ids, attention_mask, pooling_type="mean")
    emb = jax.block_until_ready(out["sentence_embedding"])
    assert emb.shape == (B, H) and emb.dtype == jnp.float32

    # Exercise the other pooling modes of the module as well.
    emb_max = jax.block_until_ready(
        sentence_bert_forward(packed, input_ids, attention_mask, "max")["sentence_embedding"])
    emb_cls = jax.block_until_ready(
        sentence_bert_forward(packed, input_ids, attention_mask, "cls")["sentence_embedding"])
    assert emb_max.shape == (B, H) and emb_cls.shape == (B, H)

    print("KERNEL_OK")
</pallas_src>

<mosaic_0001>
module attributes {stable_mosaic.version = 11 : i64} {
  func.func @sbert_fused_kernel(%arg0: i32, %arg1: memref<1x8x1xi32, #tpu.memory_space<vmem>>, %arg2: memref<1x8x8xf32, #tpu.memory_space<vmem>>, %arg3: memref<1x8x1xf32, #tpu.memory_space<vmem>>, %arg4: memref<128x128xbf16, #tpu.memory_space<vmem>>, %arg5: memref<32x768xf32, #tpu.memory_space<vmem>>, %arg6: memref<2x128x768xbf16, #tpu.memory_space<vmem>>, %arg7: memref<2x512x128xbf16, #tpu.memory_space<vmem>>, %arg8: memref<1x1x128xf32, #tpu.memory_space<vmem>>) attributes {dimension_semantics = [#tpu.dimension_semantics<parallel>], iteration_bounds = array<i64: 2>, scalar_prefetch = 0 : i64, scratch_operands = 0 : i64, tpu.core_type = #tpu.core_type<tc>, window_params = [{transform_indices = @transform_0, window_bounds = array<i64: 1, 8, 1>}, {transform_indices = @transform_1, window_bounds = array<i64: 1, 8, 8>}, {transform_indices = @transform_2, window_bounds = array<i64: 1, 8, 1>}, {pipeline_mode = #tpu.pipeline_mode<synchronous>, transform_indices = @transform_3, window_bounds = array<i64: 128, 128>}, {pipeline_mode = #tpu.pipeline_mode<synchronous>, transform_indices = @transform_4, window_bounds = array<i64: 32, 768>}, {pipeline_mode = #tpu.pipeline_mode<synchronous>, transform_indices = @transform_5, window_bounds = array<i64: 2, 128, 768>}, {pipeline_mode = #tpu.pipeline_mode<synchronous>, transform_indices = @transform_6, window_bounds = array<i64: 2, 512, 128>}, {transform_indices = @transform_7, window_bounds = array<i64: 1, 1, 128>}]} {
    %0 = tpu.iota {dimensions = array<i32: 1>} : vector<8x128xi32>
    %c32_i32 = arith.constant 32 : i32
    %1 = vector.broadcast %c32_i32 : i32 to vector<8x128xi32>
    %2 = arith.cmpi slt, %0, %1 : vector<8x128xi32>
    %3 = arith.extui %2 : vector<8x128xi1> to vector<8x128xi32>
    %4 = arith.sitofp %3 : vector<8x128xi32> to vector<8x128xf32>
    %c0 = arith.constant 0 : index
    %c0_0 = arith.constant 0 : index
    %c0_1 = arith.constant 0 : index
    %5 = vector.load %arg2[%c0, %c0_0, %c0_1] : memref<1x8x8xf32, #tpu.memory_space<vmem>>, vector<1x8x8xf32>
    %6 = vector.shape_cast %5 : vector<1x8x8xf32> to vector<8x8xf32>
    %c0_2 = arith.constant 0 : index
    %c0_3 = arith.constant 0 : index
    %c0_4 = arith.constant 0 : index
    %7 = vector.load %arg1[%c0_2, %c0_3, %c0_4] : memref<1x8x1xi32, #tpu.memory_space<vmem>>, vector<1x8x1xi32>
    %8 = vector.shape_cast %7 : vector<1x8x1xi32> to vector<8x1xi32>
    %c0_5 = arith.constant 0 : index
    %c0_6 = arith.constant 0 : index
    %c0_7 = arith.constant 0 : index
    %9 = vector.load %arg3[%c0_5, %c0_6, %c0_7] : memref<1x8x1xf32, #tpu.memory_space<vmem>>, vector<1x8x1xf32>
    %10 = vector.shape_cast %9 : vector<1x8x1xf32> to vector<8x1xf32>
    %11 = tpu.iota {dimensions = array<i32: 1>} : vector<8x128xi32>
    %12 = vector.broadcast %8 : vector<8x1xi32> to vector<8x128xi32>
    %13 = arith.cmpi eq, %11, %12 : vector<8x128xi32>
    %14 = arith.extui %13 : vector<8x128xi1> to vector<8x128xi32>
    %15 = arith.sitofp %14 : vector<8x128xi32> to vector<8x128xf32>
    %16 = arith.truncf %15 : vector<8x128xf32> to vector<8x128xbf16>
    %c0_8 = arith.constant 0 : index
    %c0_9 = arith.constant 0 : index
    %17 = vector.load %arg4[%c0_8, %c0_9] : memref<128x128xbf16, #tpu.memory_space<vmem>>, vector<128x128xbf16>
    %cst = arith.constant dense<0.000000e+00> : vector<8x128xf32>
    %18 = tpu.matmul %16, %17, %cst {dimension_numbers = #tpu.dot_dimension_numbers<[1], [0], [0], [1], [0, 0, 1, 1], [], []>} : vector<8x128xbf16>, vector<128x128xbf16>, vector<8x128xf32> -> vector<8x128xf32>
    %c0_10 = arith.constant 0 : index
    %c0_11 = arith.constant 0 : index
    %19 = vector.load %arg5[%c0_10, %c0_11] : memref<32x768xf32, #tpu.memory_space<vmem>>, vector<8x128xf32>
    %20 = arith.addf %18, %19 : vector<8x128xf32>
    %c8 = arith.constant 8 : index
    %c0_12 = arith.constant 0 : index
    %21 = vector.load %arg5[%c8, %c0_12] : memref<32x768xf32, #tpu.memory_space<vmem>>, vector<1x128xf32>
    %c9 = arith.constant 9 : index
    %c0_13 = arith.constant 0 : index
    %22 = vector.load %arg5[%c9, %c0_13] : memref<32x768xf32, #tpu.memory_space<vmem>>, vector<1x128xf32>
    %cst_14 = arith.constant dense<0.000000e+00> : vector<8xf32>
    %23 = vector.multi_reduction <add>, %20, %cst_14 [1] : vector<8x128xf32> to vector<8xf32>
    %24 = vector.shape_cast %23 : vector<8xf32> to vector<8x1xf32>
    %cst_15 = arith.constant 3.125000e-02 : f32
    %25 = vector.broadcast %cst_15 : f32 to vector<8x1xf32>
    %26 = arith.mulf %24, %25 : vector<8x1xf32>
    %27 = vector.broadcast %26 : vector<8x1xf32> to vector<8x128xf32>
    %28 = arith.subf %20, %27 : vector<8x128xf32>
    %29 = arith.mulf %28, %4 : vector<8x128xf32>
    %30 = arith.mulf %29, %29 : vector<8x128xf32>
    %cst_16 = arith.constant dense<0.000000e+00> : vector<8xf32>
    %31 = vector.multi_reduction <add>, %30, %cst_16 [1] : vector<8x128xf32> to vector<8xf32>
    %32 = vector.shape_cast %31 : vector<8xf32> to vector<8x1xf32>
    %cst_17 = arith.constant 3.125000e-02 : f32
    %33 = vector.broadcast %cst_17 : f32 to vector<8x1xf32>
    %34 = arith.mulf %32, %33 : vector<8x1xf32>
    %cst_18 = arith.constant 9.99999996E-13 : f32
    %35 = vector.broadcast %cst_18 : f32 to vector<8x1xf32>
    %36 = arith.addf %34, %35 : vector<8x1xf32>
    %37 = math.rsqrt %36 : vector<8x1xf32>
    %38 = vector.broadcast %37 : vector<8x1xf32> to vector<8x128xf32>
    %39 = arith.mulf %29, %38 : vector<8x128xf32>
    %40 = vector.broadcast %21 : vector<1x128xf32> to vector<8x128xf32>
    %41 = arith.mulf %39, %40 : vector<8x128xf32>
    %42 = vector.broadcast %22 : vector<1x128xf32> to vector<8x128xf32>
    %43 = arith.addf %41, %42 : vector<8x128xf32>
    %c16 = arith.constant 16 : index
    %c0_19 = arith.constant 0 : index
    %44 = vector.load %arg5[%c16, %c0_19] : memref<32x768xf32, #tpu.memory_space<vmem>>, vector<1x768xf32>
    %c17 = arith.constant 17 : index
    %c0_20 = arith.constant 0 : index
    %45 = vector.load %arg5[%c17, %c0_20] : memref<32x768xf32, #tpu.memory_space<vmem>>, vector<1x128xf32>
    %c18 = arith.constant 18 : index
    %c0_21 = arith.constant 0 : index
    %46 = vector.load %arg5[%c18, %c0_21] : memref<32x768xf32, #tpu.memory_space<vmem>>, vector<1x128xf32>
    %c19 = arith.constant 19 : index
    %c0_22 = arith.constant 0 : index
    %47 = vector.load %arg5[%c19, %c0_22] : memref<32x768xf32, #tpu.memory_space<vmem>>, vector<1x128xf32>
    %c20 = arith.constant 20 : index
    %c0_23 = arith.constant 0 : index
    %48 = vector.load %arg5[%c20, %c0_23] : memref<32x768xf32, #tpu.memory_space<vmem>>, vector<1x128xf32>
    %c21 = arith.constant 21 : index
    %c0_24 = arith.constant 0 : index
    %49 = vector.load %arg5[%c21, %c0_24] : memref<32x768xf32, #tpu.memory_space<vmem>>, vector<1x128xf32>
    %c22 = arith.constant 22 : index
    %c0_25 = arith.constant 0 : index
    %50 = vector.load %arg5[%c22, %c0_25] : memref<32x768xf32, #tpu.memory_space<vmem>>, vector<1x128xf32>
    %c23 = arith.constant 23 : index
    %c0_26 = arith.constant 0 : index
    %51 = vector.load %arg5[%c23, %c0_26] : memref<32x768xf32, #tpu.memory_space<vmem>>, vector<1x128xf32>
    %c0_27 = arith.constant 0 : index
    %c0_28 = arith.constant 0 : index
    %c0_29 = arith.constant 0 : index
    %52 = vector.load %arg6[%c0_27, %c0_28, %c0_29] : memref<2x128x768xbf16, #tpu.memory_space<vmem>>, vector<1x128x768xbf16>
    %53 = vector.shape_cast %52 : vector<1x128x768xbf16> to vector<128x768xbf16>
    %c0_30 = arith.constant 0 : index
    %c0_31 = arith.constant 0 : index
    %c0_32 = arith.constant 0 : index
    %54 = vector.load %arg7[%c0_30, %c0_31, %c0_32] : memref<2x512x128xbf16, #tpu.memory_space<vmem>>, vector<1x256x128xbf16>
    %55 = vector.shape_cast %54 : vector<1x256x128xbf16> to vector<256x128xbf16>
    %c0_33 = arith.constant 0 : index
    %c256 = arith.constant 256 : index
    %c0_34 = arith.constant 0 : index
    %56 = vector.load %arg7[%c0_33, %c256, %c0_34] : memref<2x512x128xbf16, #tpu.memory_space<vmem>>, vector<1x128x128xbf16>
    %57 = vector.shape_cast %56 : vector<1x128x128xbf16> to vector<128x128xbf16>
    %c0_35 = arith.constant 0 : index
    %c384 = arith.constant 384 : index
    %c0_36 = arith.constant 0 : index
    %58 = vector.load %arg7[%c0_35, %c384, %c0_36] : memref<2x512x128xbf16, #tpu.memory_space<vmem>>, vector<1x128x128xbf16>
    %59 = vector.shape_cast %58 : vector<1x128x128xbf16> to vector<128x128xbf16>
    %60 = arith.truncf %43 : vector<8x128xf32> to vector<8x128xbf16>
    %cst_37 = arith.constant dense<0.000000e+00> : vector<8x768xf32>
    %61 = tpu.matmul %60, %53, %cst_37 {dimension_numbers = #tpu.dot_dimension_numbers<[1], [0], [0], [1], [0, 0, 1, 1], [], []>} : vector<8x128xbf16>, vector<128x768xbf16>, vector<8x768xf32> -> vector<8x768xf32>
    %62 = vector.broadcast %44 : vector<1x768xf32> to vector<8x768xf32>
    %63 = arith.addf %61, %62 : vector<8x768xf32>
    %64 = vector.extract_strided_slice %63 {offsets = [0, 0], sizes = [8, 128], strides = [1, 1]} : vector<8x768xf32> to vector<8x128xf32>
    %65 = arith.truncf %64 : vector<8x128xf32> to vector<8x128xbf16>
    %66 = vector.extract_strided_slice %63 {offsets = [0, 256], sizes = [8, 128], strides = [1, 1]} : vector<8x768xf32> to vector<8x128xf32>
    %67 = arith.truncf %66 : vector<8x128xf32> to vector<8x128xbf16>
    %68 = vector.extract_strided_slice %63 {offsets = [0, 512], sizes = [8, 128], strides = [1, 1]} : vector<8x768xf32> to vector<8x128xf32>
    %69 = arith.truncf %68 : vector<8x128xf32> to vector<8x128xbf16>
    %cst_38 = arith.constant dense<0.000000e+00> : vector<8x8xf32>
    %70 = tpu.matmul %65, %67, %cst_38 {dimension_numbers = #tpu.dot_dimension_numbers<[1], [1], [0], [0], [0, 0, 1, 0], [], []>} : vector<8x128xbf16>, vector<8x128xbf16>, vector<8x8xf32> -> vector<8x8xf32>
    %71 = arith.addf %70, %6 : vector<8x8xf32>
    %cst_39 = arith.constant dense<0xFF800000> : vector<8xf32>
    %72 = vector.multi_reduction <maximumf>, %71, %cst_39 [1] : vector<8x8xf32> to vector<8xf32>
    %73 = vector.shape_cast %72 : vector<8xf32> to vector<8x1xf32>
    %74 = vector.broadcast %73 : vector<8x1xf32> to vector<8x8xf32>
    %75 = arith.subf %71, %74 : vector<8x8xf32>
    %76 = math.exp %75 : vector<8x8xf32>
    %cst_40 = arith.constant dense<0.000000e+00> : vector<8xf32>
    %77 = vector.multi_reduction <add>, %76, %cst_40 [1] : vector<8x8xf32> to vector<8xf32>
    %78 = vector.shape_cast %77 : vector<8xf32> to vector<8x1xf32>
    %79 = tpu.reciprocal %78 {approx = true} : vector<8x1xf32> -> vector<8x1xf32>
    %80 = vector.broadcast %79 : vector<8x1xf32> to vector<8x8xf32>
    %81 = arith.mulf %76, %80 : vector<8x8xf32>
    %82 = arith.truncf %81 : vector<8x8xf32> to vector<8x8xbf16>
    %cst_41 = arith.constant dense<0.000000e+00> : vector<8x128xf32>
    %83 = tpu.matmul %82, %69, %cst_41 {dimension_numbers = #tpu.dot_dimension_numbers<[1], [0], [0], [1], [0, 0, 1, 1], [], []>} : vector<8x8xbf16>, vector<8x128xbf16>, vector<8x128xf32> -> vector<8x128xf32>
    %84 = vector.extract_strided_slice %63 {offsets = [0, 128], sizes = [8, 128], strides = [1, 1]} : vector<8x768xf32> to vector<8x128xf32>
    %85 = arith.truncf %84 : vector<8x128xf32> to vector<8x128xbf16>
    %86 = vector.extract_strided_slice %63 {offsets = [0, 384], sizes = [8, 128], strides = [1, 1]} : vector<8x768xf32> to vector<8x128xf32>
    %87 = arith.truncf %86 : vector<8x128xf32> to vector<8x128xbf16>
    %88 = vector.extract_strided_slice %63 {offsets = [0, 640], sizes = [8, 128], strides = [1, 1]} : vector<8x768xf32> to vector<8x128xf32>
    %89 = arith.truncf %88 : vector<8x128xf32> to vector<8x128xbf16>
    %cst_42 = arith.constant dense<0.000000e+00> : vector<8x8xf32>
    %90 = tpu.matmul %85, %87, %cst_42 {dimension_numbers = #tpu.dot_dimension_numbers<[1], [1], [0], [0], [0, 0, 1, 0], [], []>} : vector<8x128xbf16>, vector<8x128xbf16>, vector<8x8xf32> -> vector<8x8xf32>
    %91 = arith.addf %90, %6 : vector<8x8xf32>
    %cst_43 = arith.constant dense<0xFF800000> : vector<8xf32>
    %92 = vector.multi_reduction <maximumf>, %91, %cst_43 [1] : vector<8x8xf32> to vector<8xf32>
    %93 = vector.shape_cast %92 : vector<8xf32> to vector<8x1xf32>
    %94 = vector.broadcast %93 : vector<8x1xf32> to vector<8x8xf32>
    %95 = arith.subf %91, %94 : vector<8x8xf32>
    %96 = math.exp %95 : vector<8x8xf32>
    %cst_44 = arith.constant dense<0.000000e+00> : vector<8xf32>
    %97 = vector.multi_reduction <add>, %96, %cst_44 [1] : vector<8x8xf32> to vector<8xf32>
    %98 = vector.shape_cast %97 : vector<8xf32> to vector<8x1xf32>
    %99 = tpu.reciprocal %98 {approx = true} : vector<8x1xf32> -> vector<8x1xf32>
    %100 = vector.broadcast %99 : vector<8x1xf32> to vector<8x8xf32>
    %101 = arith.mulf %96, %100 : vector<8x8xf32>
    %102 = arith.truncf %101 : vector<8x8xf32> to vector<8x8xbf16>
    %cst_45 = arith.constant dense<0.000000e+00> : vector<8x128xf32>
    %103 = tpu.matmul %102, %89, %cst_45 {dimension_numbers = #tpu.dot_dimension_numbers<[1], [0], [0], [1], [0, 0, 1, 1], [], []>} : vector<8x8xbf16>, vector<8x128xbf16>, vector<8x128xf32> -> vector<8x128xf32>
    %104 = tpu.concatenate %83, %103 in 1 : vector<8x128xf32>, vector<8x128xf32> -> vector<8x256xf32>
    %105 = arith.truncf %104 : vector<8x256xf32> to vector<8x256xbf16>
    %cst_46 = arith.constant dense<0.000000e+00> : vector<8x128xf32>
    %106 = tpu.matmul %105, %55, %cst_46 {dimension_numbers = #tpu.dot_dimension_numbers<[1], [0], [0], [1], [0, 0, 1, 1], [], []>} : vector<8x256xbf16>, vector<256x128xbf16>, vector<8x128xf32> -> vector<8x128xf32>
    %107 = vector.broadcast %45 : vector<1x128xf32> to vector<8x128xf32>
    %108 = arith.addf %106, %107 : vector<8x128xf32>
    %109 = arith.addf %43, %108 : vector<8x128xf32>
    %cst_47 = arith.constant dense<0.000000e+00> : vector<8xf32>
    %110 = vector.multi_reduction <add>, %109, %cst_47 [1] : vector<8x128xf32> to vector<8xf32>
    %111 = vector.shape_cast %110 : vector<8xf32> to vector<8x1xf32>
    %cst_48 = arith.constant 3.125000e-02 : f32
    %112 = vector.broadcast %cst_48 : f32 to vector<8x1xf32>
    %113 = arith.mulf %111, %112 : vector<8x1xf32>
    %114 = vector.broadcast %113 : vector<8x1xf32> to vector<8x128xf32>
    %115 = arith.subf %109, %114 : vector<8x128xf32>
    %116 = arith.mulf %115, %4 : vector<8x128xf32>
    %117 = arith.mulf %116, %116 : vector<8x128xf32>
    %cst_49 = arith.constant dense<0.000000e+00> : vector<8xf32>
    %118 = vector.multi_reduction <add>, %117, %cst_49 [1] : vector<8x128xf32> to vector<8xf32>
    %119 = vector.shape_cast %118 : vector<8xf32> to vector<8x1xf32>
    %cst_50 = arith.constant 3.125000e-02 : f32
    %120 = vector.broadcast %cst_50 : f32 to vector<8x1xf32>
    %121 = arith.mulf %119, %120 : vector<8x1xf32>
    %cst_51 = arith.constant 9.99999996E-13 : f32
    %122 = vector.broadcast %cst_51 : f32 to vector<8x1xf32>
    %123 = arith.addf %121, %122 : vector<8x1xf32>
    %124 = math.rsqrt %123 : vector<8x1xf32>
    %125 = vector.broadcast %124 : vector<8x1xf32> to vector<8x128xf32>
    %126 = arith.mulf %116, %125 : vector<8x128xf32>
    %127 = vector.broadcast %46 : vector<1x128xf32> to vector<8x128xf32>
    %128 = arith.mulf %126, %127 : vector<8x128xf32>
    %129 = vector.broadcast %47 : vector<1x128xf32> to vector<8x128xf32>
    %130 = arith.addf %128, %129 : vector<8x128xf32>
    %131 = arith.truncf %130 : vector<8x128xf32> to vector<8x128xbf16>
    %cst_52 = arith.constant dense<0.000000e+00> : vector<8x128xf32>
    %132 = tpu.matmul %131, %57, %cst_52 {dimension_numbers = #tpu.dot_dimension_numbers<[1], [0], [0], [1], [0, 0, 1, 1], [], []>} : vector<8x128xbf16>, vector<128x128xbf16>, vector<8x128xf32> -> vector<8x128xf32>
    %133 = vector.broadcast %48 : vector<1x128xf32> to vector<8x128xf32>
    %134 = arith.addf %132, %133 : vector<8x128xf32>
    %135 = arith.mulf %134, %134 : vector<8x128xf32>
    %136 = arith.mulf %134, %135 : vector<8x128xf32>
    %cst_53 = arith.constant 4.471500e-02 : f32
    %137 = vector.broadcast %cst_53 : f32 to vector<8x128xf32>
    %138 = arith.mulf %137, %136 : vector<8x128xf32>
    %139 = arith.addf %134, %138 : vector<8x128xf32>
    %cst_54 = arith.constant 0.797884583 : f32
    %140 = vector.broadcast %cst_54 : f32 to vector<8x128xf32>
    %141 = arith.mulf %140, %139 : vector<8x128xf32>
    %142 = math.tanh %141 : vector<8x128xf32>
    %cst_55 = arith.constant 1.000000e+00 : f32
    %143 = vector.broadcast %cst_55 : f32 to vector<8x128xf32>
    %144 = arith.addf %143, %142 : vector<8x128xf32>
    %cst_56 = arith.constant 5.000000e-01 : f32
    %145 = vector.broadcast %cst_56 : f32 to vector<8x128xf32>
    %146 = arith.mulf %145, %144 : vector<8x128xf32>
    %147 = arith.mulf %134, %146 : vector<8x128xf32>
    %148 = arith.truncf %147 : vector<8x128xf32> to vector<8x128xbf16>
    %cst_57 = arith.constant dense<0.000000e+00> : vector<8x128xf32>
    %149 = tpu.matmul %148, %59, %cst_57 {dimension_numbers = #tpu.dot_dimension_numbers<[1], [0], [0], [1], [0, 0, 1, 1], [], []>} : vector<8x128xbf16>, vector<128x128xbf16>, vector<8x128xf32> -> vector<8x128xf32>
    %150 = vector.broadcast %49 : vector<1x128xf32> to vector<8x128xf32>
    %151 = arith.addf %149, %150 : vector<8x128xf32>
    %152 = arith.addf %130, %151 : vector<8x128xf32>
    %cst_58 = arith.constant dense<0.000000e+00> : vector<8xf32>
    %153 = vector.multi_reduction <add>, %152, %cst_58 [1] : vector<8x128xf32> to vector<8xf32>
    %154 = vector.shape_cast %153 : vector<8xf32> to vector<8x1xf32>
    %cst_59 = arith.constant 3.125000e-02 : f32
    %155 = vector.broadcast %cst_59 : f32 to vector<8x1xf32>
    %156 = arith.mulf %154, %155 : vector<8x1xf32>
    %157 = vector.broadcast %156 : vector<8x1xf32> to vector<8x128xf32>
    %158 = arith.subf %152, %157 : vector<8x128xf32>
    %159 = arith.mulf %158, %4 : vector<8x128xf32>
    %160 = arith.mulf %159, %159 : vector<8x128xf32>
    %cst_60 = arith.constant dense<0.000000e+00> : vector<8xf32>
    %161 = vector.multi_reduction <add>, %160, %cst_60 [1] : vector<8x128xf32> to vector<8xf32>
    %162 = vector.shape_cast %161 : vector<8xf32> to vector<8x1xf32>
    %cst_61 = arith.constant 3.125000e-02 : f32
    %163 = vector.broadcast %cst_61 : f32 to vector<8x1xf32>
    %164 = arith.mulf %162, %163 : vector<8x1xf32>
    %cst_62 = arith.constant 9.99999996E-13 : f32
    %165 = vector.broadcast %cst_62 : f32 to vector<8x1xf32>
    %166 = arith.addf %164, %165 : vector<8x1xf32>
    %167 = math.rsqrt %166 : vector<8x1xf32>
    %168 = vector.broadcast %167 : vector<8x1xf32> to vector<8x128xf32>
    %169 = arith.mulf %159, %168 : vector<8x128xf32>
    %170 = vector.broadcast %50 : vector<1x128xf32> to vector<8x128xf32>
    %171 = arith.mulf %169, %170 : vector<8x128xf32>
    %172 = vector.broadcast %51 : vector<1x128xf32> to vector<8x128xf32>
    %173 = arith.addf %171, %172 : vector<8x128xf32>
    %c24 = arith.constant 24 : index
    %c0_63 = arith.constant 0 : index
    %174 = vector.load %arg5[%c24, %c0_63] : memref<32x768xf32, #tpu.memory_space<vmem>>, vector<1x768xf32>
    %c25 = arith.constant 25 : index
    %c0_64 = arith.constant 0 : index
    %175 = vector.load %arg5[%c25, %c0_64] : memref<32x768xf32, #tpu.memory_space<vmem>>, vector<1x128xf32>
    %c26 = arith.constant 26 : index
    %c0_65 = arith.constant 0 : index
    %176 = vector.load %arg5[%c26, %c0_65] : memref<32x768xf32, #tpu.memory_space<vmem>>, vector<1x128xf32>
    %c27 = arith.constant 27 : index
    %c0_66 = arith.constant 0 : index
    %177 = vector.load %arg5[%c27, %c0_66] : memref<32x768xf32, #tpu.memory_space<vmem>>, vector<1x128xf32>
    %c28 = arith.constant 28 : index
    %c0_67 = arith.constant 0 : index
    %178 = vector.load %arg5[%c28, %c0_67] : memref<32x768xf32, #tpu.memory_space<vmem>>, vector<1x128xf32>
    %c29 = arith.constant 29 : index
    %c0_68 = arith.constant 0 : index
    %179 = vector.load %arg5[%c29, %c0_68] : memref<32x768xf32, #tpu.memory_space<vmem>>, vector<1x128xf32>
    %c30 = arith.constant 30 : index
    %c0_69 = arith.constant 0 : index
    %180 = vector.load %arg5[%c30, %c0_69] : memref<32x768xf32, #tpu.memory_space<vmem>>, vector<1x128xf32>
    %c31 = arith.constant 31 : index
    %c0_70 = arith.constant 0 : index
    %181 = vector.load %arg5[%c31, %c0_70] : memref<32x768xf32, #tpu.memory_space<vmem>>, vector<1x128xf32>
    %c1 = arith.constant 1 : index
    %c0_71 = arith.constant 0 : index
    %c0_72 = arith.constant 0 : index
    %182 = vector.load %arg6[%c1, %c0_71, %c0_72] : memref<2x128x768xbf16, #tpu.memory_space<vmem>>, vector<1x128x768xbf16>
    %183 = vector.shape_cast %182 : vector<1x128x768xbf16> to vector<128x768xbf16>
    %c1_73 = arith.constant 1 : index
    %c0_74 = arith.constant 0 : index
    %c0_75 = arith.constant 0 : index
    %184 = vector.load %arg7[%c1_73, %c0_74, %c0_75] : memref<2x512x128xbf16, #tpu.memory_space<vmem>>, vector<1x256x128xbf16>
    %185 = vector.shape_cast %184 : vector<1x256x128xbf16> to vector<256x128xbf16>
    %c1_76 = arith.constant 1 : index
    %c256_77 = arith.constant 256 : index
    %c0_78 = arith.constant 0 : index
    %186 = vector.load %arg7[%c1_76, %c256_77, %c0_78] : memref<2x512x128xbf16, #tpu.memory_space<vmem>>, vector<1x128x128xbf16>
    %187 = vector.shape_cast %186 : vector<1x128x128xbf16> to vector<128x128xbf16>
    %c1_79 = arith.constant 1 : index
    %c384_80 = arith.constant 384 : index
    %c0_81 = arith.constant 0 : index
    %188 = vector.load %arg7[%c1_79, %c384_80, %c0_81] : memref<2x512x128xbf16, #tpu.memory_space<vmem>>, vector<1x128x128xbf16>
    %189 = vector.shape_cast %188 : vector<1x128x128xbf16> to vector<128x128xbf16>
    %190 = arith.truncf %173 : vector<8x128xf32> to vector<8x128xbf16>
    %cst_82 = arith.constant dense<0.000000e+00> : vector<8x768xf32>
    %191 = tpu.matmul %190, %183, %cst_82 {dimension_numbers = #tpu.dot_dimension_numbers<[1], [0], [0], [1], [0, 0, 1, 1], [], []>} : vector<8x128xbf16>, vector<128x768xbf16>, vector<8x768xf32> -> vector<8x768xf32>
    %192 = vector.broadcast %174 : vector<1x768xf32> to vector<8x768xf32>
    %193 = arith.addf %191, %192 : vector<8x768xf32>
    %194 = vector.extract_strided_slice %193 {offsets = [0, 0], sizes = [8, 128], strides = [1, 1]} : vector<8x768xf32> to vector<8x128xf32>
    %195 = arith.truncf %194 : vector<8x128xf32> to vector<8x128xbf16>
    %196 = vector.extract_strided_slice %193 {offsets = [0, 256], sizes = [8, 128], strides = [1, 1]} : vector<8x768xf32> to vector<8x128xf32>
    %197 = arith.truncf %196 : vector<8x128xf32> to vector<8x128xbf16>
    %198 = vector.extract_strided_slice %193 {offsets = [0, 512], sizes = [8, 128], strides = [1, 1]} : vector<8x768xf32> to vector<8x128xf32>
    %199 = arith.truncf %198 : vector<8x128xf32> to vector<8x128xbf16>
    %cst_83 = arith.constant dense<0.000000e+00> : vector<8x8xf32>
    %200 = tpu.matmul %195, %197, %cst_83 {dimension_numbers = #tpu.dot_dimension_numbers<[1], [1], [0], [0], [0, 0, 1, 0], [], []>} : vector<8x128xbf16>, vector<8x128xbf16>, vector<8x8xf32> -> vector<8x8xf32>
    %201 = arith.addf %200, %6 : vector<8x8xf32>
    %cst_84 = arith.constant dense<0xFF800000> : vector<8xf32>
    %202 = vector.multi_reduction <maximumf>, %201, %cst_84 [1] : vector<8x8xf32> to vector<8xf32>
    %203 = vector.shape_cast %202 : vector<8xf32> to vector<8x1xf32>
    %204 = vector.broadcast %203 : vector<8x1xf32> to vector<8x8xf32>
    %205 = arith.subf %201, %204 : vector<8x8xf32>
    %206 = math.exp %205 : vector<8x8xf32>
    %cst_85 = arith.constant dense<0.000000e+00> : vector<8xf32>
    %207 = vector.multi_reduction <add>, %206, %cst_85 [1] : vector<8x8xf32> to vector<8xf32>
    %208 = vector.shape_cast %207 : vector<8xf32> to vector<8x1xf32>
    %209 = tpu.reciprocal %208 {approx = true} : vector<8x1xf32> -> vector<8x1xf32>
    %210 = vector.broadcast %209 : vector<8x1xf32> to vector<8x8xf32>
    %211 = arith.mulf %206, %210 : vector<8x8xf32>
    %212 = arith.truncf %211 : vector<8x8xf32> to vector<8x8xbf16>
    %cst_86 = arith.constant dense<0.000000e+00> : vector<8x128xf32>
    %213 = tpu.matmul %212, %199, %cst_86 {dimension_numbers = #tpu.dot_dimension_numbers<[1], [0], [0], [1], [0, 0, 1, 1], [], []>} : vector<8x8xbf16>, vector<8x128xbf16>, vector<8x128xf32> -> vector<8x128xf32>
    %214 = vector.extract_strided_slice %193 {offsets = [0, 128], sizes = [8, 128], strides = [1, 1]} : vector<8x768xf32> to vector<8x128xf32>
    %215 = arith.truncf %214 : vector<8x128xf32> to vector<8x128xbf16>
    %216 = vector.extract_strided_slice %193 {offsets = [0, 384], sizes = [8, 128], strides = [1, 1]} : vector<8x768xf32> to vector<8x128xf32>
    %217 = arith.truncf %216 : vector<8x128xf32> to vector<8x128xbf16>
    %218 = vector.extract_strided_slice %193 {offsets = [0, 640], sizes = [8, 128], strides = [1, 1]} : vector<8x768xf32> to vector<8x128xf32>
    %219 = arith.truncf %218 : vector<8x128xf32> to vector<8x128xbf16>
    %cst_87 = arith.constant dense<0.000000e+00> : vector<8x8xf32>
    %220 = tpu.matmul %215, %217, %cst_87 {dimension_numbers = #tpu.dot_dimension_numbers<[1], [1], [0], [0], [0, 0, 1, 0], [], []>} : vector<8x128xbf16>, vector<8x128xbf16>, vector<8x8xf32> -> vector<8x8xf32>
    %221 = arith.addf %220, %6 : vector<8x8xf32>
    %cst_88 = arith.constant dense<0xFF800000> : vector<8xf32>
    %222 = vector.multi_reduction <maximumf>, %221, %cst_88 [1] : vector<8x8xf32> to vector<8xf32>
    %223 = vector.shape_cast %222 : vector<8xf32> to vector<8x1xf32>
    %224 = vector.broadcast %223 : vector<8x1xf32> to vector<8x8xf32>
    %225 = arith.subf %221, %224 : vector<8x8xf32>
    %226 = math.exp %225 : vector<8x8xf32>
    %cst_89 = arith.constant dense<0.000000e+00> : vector<8xf32>
    %227 = vector.multi_reduction <add>, %226, %cst_89 [1] : vector<8x8xf32> to vector<8xf32>
    %228 = vector.shape_cast %227 : vector<8xf32> to vector<8x1xf32>
    %229 = tpu.reciprocal %228 {approx = true} : vector<8x1xf32> -> vector<8x1xf32>
    %230 = vector.broadcast %229 : vector<8x1xf32> to vector<8x8xf32>
    %231 = arith.mulf %226, %230 : vector<8x8xf32>
    %232 = arith.truncf %231 : vector<8x8xf32> to vector<8x8xbf16>
    %cst_90 = arith.constant dense<0.000000e+00> : vector<8x128xf32>
    %233 = tpu.matmul %232, %219, %cst_90 {dimension_numbers = #tpu.dot_dimension_numbers<[1], [0], [0], [1], [0, 0, 1, 1], [], []>} : vector<8x8xbf16>, vector<8x128xbf16>, vector<8x128xf32> -> vector<8x128xf32>
    %234 = tpu.concatenate %213, %233 in 1 : vector<8x128xf32>, vector<8x128xf32> -> vector<8x256xf32>
    %235 = arith.truncf %234 : vector<8x256xf32> to vector<8x256xbf16>
    %cst_91 = arith.constant dense<0.000000e+00> : vector<8x128xf32>
    %236 = tpu.matmul %235, %185, %cst_91 {dimension_numbers = #tpu.dot_dimension_numbers<[1], [0], [0], [1], [0, 0, 1, 1], [], []>} : vector<8x256xbf16>, vector<256x128xbf16>, vector<8x128xf32> -> vector<8x128xf32>
    %237 = vector.broadcast %175 : vector<1x128xf32> to vector<8x128xf32>
    %238 = arith.addf %236, %237 : vector<8x128xf32>
    %239 = arith.addf %173, %238 : vector<8x128xf32>
    %cst_92 = arith.constant dense<0.000000e+00> : vector<8xf32>
    %240 = vector.multi_reduction <add>, %239, %cst_92 [1] : vector<8x128xf32> to vector<8xf32>
    %241 = vector.shape_cast %240 : vector<8xf32> to vector<8x1xf32>
    %cst_93 = arith.constant 3.125000e-02 : f32
    %242 = vector.broadcast %cst_93 : f32 to vector<8x1xf32>
    %243 = arith.mulf %241, %242 : vector<8x1xf32>
    %244 = vector.broadcast %243 : vector<8x1xf32> to vector<8x128xf32>
    %245 = arith.subf %239, %244 : vector<8x128xf32>
    %246 = arith.mulf %245, %4 : vector<8x128xf32>
    %247 = arith.mulf %246, %246 : vector<8x128xf32>
    %cst_94 = arith.constant dense<0.000000e+00> : vector<8xf32>
    %248 = vector.multi_reduction <add>, %247, %cst_94 [1] : vector<8x128xf32> to vector<8xf32>
    %249 = vector.shape_cast %248 : vector<8xf32> to vector<8x1xf32>
    %cst_95 = arith.constant 3.125000e-02 : f32
    %250 = vector.broadcast %cst_95 : f32 to vector<8x1xf32>
    %251 = arith.mulf %249, %250 : vector<8x1xf32>
    %cst_96 = arith.constant 9.99999996E-13 : f32
    %252 = vector.broadcast %cst_96 : f32 to vector<8x1xf32>
    %253 = arith.addf %251, %252 : vector<8x1xf32>
    %254 = math.rsqrt %253 : vector<8x1xf32>
    %255 = vector.broadcast %254 : vector<8x1xf32> to vector<8x128xf32>
    %256 = arith.mulf %246, %255 : vector<8x128xf32>
    %257 = vector.broadcast %176 : vector<1x128xf32> to vector<8x128xf32>
    %258 = arith.mulf %256, %257 : vector<8x128xf32>
    %259 = vector.broadcast %177 : vector<1x128xf32> to vector<8x128xf32>
    %260 = arith.addf %258, %259 : vector<8x128xf32>
    %261 = arith.truncf %260 : vector<8x128xf32> to vector<8x128xbf16>
    %cst_97 = arith.constant dense<0.000000e+00> : vector<8x128xf32>
    %262 = tpu.matmul %261, %187, %cst_97 {dimension_numbers = #tpu.dot_dimension_numbers<[1], [0], [0], [1], [0, 0, 1, 1], [], []>} : vector<8x128xbf16>, vector<128x128xbf16>, vector<8x128xf32> -> vector<8x128xf32>
    %263 = vector.broadcast %178 : vector<1x128xf32> to vector<8x128xf32>
    %264 = arith.addf %262, %263 : vector<8x128xf32>
    %265 = arith.mulf %264, %264 : vector<8x128xf32>
    %266 = arith.mulf %264, %265 : vector<8x128xf32>
    %cst_98 = arith.constant 4.471500e-02 : f32
    %267 = vector.broadcast %cst_98 : f32 to vector<8x128xf32>
    %268 = arith.mulf %267, %266 : vector<8x128xf32>
    %269 = arith.addf %264, %268 : vector<8x128xf32>
    %cst_99 = arith.constant 0.797884583 : f32
    %270 = vector.broadcast %cst_99 : f32 to vector<8x128xf32>
    %271 = arith.mulf %270, %269 : vector<8x128xf32>
    %272 = math.tanh %271 : vector<8x128xf32>
    %cst_100 = arith.constant 1.000000e+00 : f32
    %273 = vector.broadcast %cst_100 : f32 to vector<8x128xf32>
    %274 = arith.addf %273, %272 : vector<8x128xf32>
    %cst_101 = arith.constant 5.000000e-01 : f32
    %275 = vector.broadcast %cst_101 : f32 to vector<8x128xf32>
    %276 = arith.mulf %275, %274 : vector<8x128xf32>
    %277 = arith.mulf %264, %276 : vector<8x128xf32>
    %278 = arith.truncf %277 : vector<8x128xf32> to vector<8x128xbf16>
    %cst_102 = arith.constant dense<0.000000e+00> : vector<8x128xf32>
    %279 = tpu.matmul %278, %189, %cst_102 {dimension_numbers = #tpu.dot_dimension_numbers<[1], [0], [0], [1], [0, 0, 1, 1], [], []>} : vector<8x128xbf16>, vector<128x128xbf16>, vector<8x128xf32> -> vector<8x128xf32>
    %280 = vector.broadcast %179 : vector<1x128xf32> to vector<8x128xf32>
    %281 = arith.addf %279, %280 : vector<8x128xf32>
    %282 = arith.addf %260, %281 : vector<8x128xf32>
    %cst_103 = arith.constant dense<0.000000e+00> : vector<8xf32>
    %283 = vector.multi_reduction <add>, %282, %cst_103 [1] : vector<8x128xf32> to vector<8xf32>
    %284 = vector.shape_cast %283 : vector<8xf32> to vector<8x1xf32>
    %cst_104 = arith.constant 3.125000e-02 : f32
    %285 = vector.broadcast %cst_104 : f32 to vector<8x1xf32>
    %286 = arith.mulf %284, %285 : vector<8x1xf32>
    %287 = vector.broadcast %286 : vector<8x1xf32> to vector<8x128xf32>
    %288 = arith.subf %282, %287 : vector<8x128xf32>
    %289 = arith.mulf %288, %4 : vector<8x128xf32>
    %290 = arith.mulf %289, %289 : vector<8x128xf32>
    %cst_105 = arith.constant dense<0.000000e+00> : vector<8xf32>
    %291 = vector.multi_reduction <add>, %290, %cst_105 [1] : vector<8x128xf32> to vector<8xf32>
    %292 = vector.shape_cast %291 : vector<8xf32> to vector<8x1xf32>
    %cst_106 = arith.constant 3.125000e-02 : f32
    %293 = vector.broadcast %cst_106 : f32 to vector<8x1xf32>
    %294 = arith.mulf %292, %293 : vector<8x1xf32>
    %cst_107 = arith.constant 9.99999996E-13 : f32
    %295 = vector.broadcast %cst_107 : f32 to vector<8x1xf32>
    %296 = arith.addf %294, %295 : vector<8x1xf32>
    %297 = math.rsqrt %296 : vector<8x1xf32>
    %298 = vector.broadcast %297 : vector<8x1xf32> to vector<8x128xf32>
    %299 = arith.mulf %289, %298 : vector<8x128xf32>
    %300 = vector.broadcast %180 : vector<1x128xf32> to vector<8x128xf32>
    %301 = arith.mulf %299, %300 : vector<8x128xf32>
    %302 = vector.broadcast %181 : vector<1x128xf32> to vector<8x128xf32>
    %303 = arith.addf %301, %302 : vector<8x128xf32>
    %304 = vector.broadcast %10 : vector<8x1xf32> to vector<8x128xf32>
    %305 = arith.mulf %303, %304 : vector<8x128xf32>
    %cst_108 = arith.constant dense<0.000000e+00> : vector<128xf32>
    %306 = vector.multi_reduction <add>, %305, %cst_108 [0] : vector<8x128xf32> to vector<128xf32>
    %307 = vector.shape_cast %306 : vector<128xf32> to vector<1x128xf32>
    %308 = vector.shape_cast %10 : vector<8x1xf32> to vector<1x8x1xf32>
    %cst_109 = arith.constant dense<0.000000e+00> : vector<1xf32>
    %309 = vector.multi_reduction <add>, %308, %cst_109 [1, 2] : vector<1x8x1xf32> to vector<1xf32>
    %310 = vector.shape_cast %309 : vector<1xf32> to vector<1x1x1xf32>
    %311 = vector.extract %310[0, 0, 0] : f32 from vector<1x1x1xf32>
    %312 = vector.broadcast %311 : f32 to vector<1x1xf32>
    %cst_110 = arith.constant 9.99999971E-10 : f32
    %313 = vector.broadcast %cst_110 : f32 to vector<1x1xf32>
    %314 = arith.maximumf %312, %313 : vector<1x1xf32>
    %315 = tpu.reciprocal %314 {approx = true} : vector<1x1xf32> -> vector<1x1xf32>
    %316 = vector.broadcast %315 : vector<1x1xf32> to vector<1x128xf32>
    %317 = arith.mulf %307, %316 : vector<1x128xf32>
    %c0_111 = arith.constant 0 : index
    %c0_112 = arith.constant 0 : index
    %c0_113 = arith.constant 0 : index
    %318 = vector.load %arg8[%c0_111, %c0_112, %c0_113] : memref<1x1x128xf32, #tpu.memory_space<vmem>>, vector<1x1x128xf32>
    %319 = vector.shape_cast %318 : vector<1x1x128xf32> to vector<1x128xf32>
    %320 = vector.shape_cast %317 : vector<1x128xf32> to vector<1x1x128xf32>
    tpu.vector_store %arg8[%c0_111, %c0_112, %c0_113], %320 {strides = array<i32>} : memref<1x1x128xf32, #tpu.memory_space<vmem>>, vector<1x1x128xf32>,
    return
  }
  func.func @transform_0(%arg0: i32) -> (i32, i32, i32) {
    %c0_i32 = arith.constant 0 : i32
    %c0_i32_0 = arith.constant 0 : i32
    %c0_i32_1 = arith.constant 0 : i32
    return %arg0, %c0_i32, %c0_i32_0 : i32, i32, i32
  }
  func.func @transform_1(%arg0: i32) -> (i32, i32, i32) {
    %c0_i32 = arith.constant 0 : i32
    %c0_i32_0 = arith.constant 0 : i32
    %c0_i32_1 = arith.constant 0 : i32
    return %arg0, %c0_i32, %c0_i32_0 : i32, i32, i32
  }
  func.func @transform_2(%arg0: i32) -> (i32, i32, i32) {
    %c0_i32 = arith.constant 0 : i32
    %c0_i32_0 = arith.constant 0 : i32
    %c0_i32_1 = arith.constant 0 : i32
    return %arg0, %c0_i32, %c0_i32_0 : i32, i32, i32
  }
  func.func @transform_3(%arg0: i32) -> (i32, i32) {
    %c0_i32 = arith.constant 0 : i32
    %c0_i32_0 = arith.constant 0 : i32
    %c0_i32_1 = arith.constant 0 : i32
    return %c0_i32, %c0_i32_0 : i32, i32
  }
  func.func @transform_4(%arg0: i32) -> (i32, i32) {
    %c0_i32 = arith.constant 0 : i32
    %c0_i32_0 = arith.constant 0 : i32
    %c0_i32_1 = arith.constant 0 : i32
    return %c0_i32, %c0_i32_0 : i32, i32
  }
  func.func @transform_5(%arg0: i32) -> (i32, i32, i32) {
    %c0_i32 = arith.constant 0 : i32
    %c0_i32_0 = arith.constant 0 : i32
    %c0_i32_1 = arith.constant 0 : i32
    %c0_i32_2 = arith.constant 0 : i32
    return %c0_i32, %c0_i32_0, %c0_i32_1 : i32, i32, i32
  }
  func.func @transform_6(%arg0: i32) -> (i32, i32, i32) {
    %c0_i32 = arith.constant 0 : i32
    %c0_i32_0 = arith.constant 0 : i32
    %c0_i32_1 = arith.constant 0 : i32
    %c0_i32_2 = arith.constant 0 : i32
    return %c0_i32, %c0_i32_0, %c0_i32_1 : i32, i32, i32
  }
  func.func @transform_7(%arg0: i32) -> (i32, i32, i32) {
    %c0_i32 = arith.constant 0 : i32
    %c0_i32_0 = arith.constant 0 : i32
    %c0_i32_1 = arith.constant 0 : i32
    return %arg0, %c0_i32, %c0_i32_0 : i32, i32, i32
  }
}

</mosaic_0001>

<bundles_post_ra>
// kernel: tpu_custom_call.1
= control target key start
LH: loop header
LB: loop body
LE: loop exit
PB: predicated region body
PF: predicated region fallthrough
CT: control target
= control target key end

     0   :  { %12 = vsyncpa [#allocation3], 0  ;;  %s4173_s0 = inlined_call_operand.vmem [shape: s32[2,8,1], index: 0, kind: input, shape index: {}]   ;;  %s4174_s1 = inlined_call_operand.vmem [shape: f32[2,8,8], index: 1, kind: input, shape index: {}]   ;;  %s4175_s2 = inlined_call_operand.vmem [shape: f32[2,8,1], index: 2, kind: input, shape index: {}]   ;;  %s4176_s3 = inlined_call_operand.hbm [shape: bf16[128,128], index: 3, kind: input, shape index: {}]   ;;  %s4177_s4 = inlined_call_operand.hbm [shape: f32[32,768], index: 4, kind: input, shape index: {}]   ;;  %s4178_s5 = inlined_call_operand.hbm [shape: bf16[2,128,768], index: 5, kind: input, shape index: {}]   ;;  %s4179_s6 = inlined_call_operand.hbm [shape: bf16[2,512,128], index: 6, kind: input, shape index: {}]   ;;  %s4180_s7 = inlined_call_operand.hbm [shape: f32[2,1,128], index: 7, kind: output, shape index: {}]  }
   0x1   :  { %13 = vsyncpa [#allocation6], 0 }
   0x2   :  { %14 = vsyncpa [#allocation9], 0 }
   0x3   :  { %15 = vsyncpa [#allocation4], 0 }
   0x4   :  { %17 = vsyncpa [#allocation4 + $0x1], 0  ;;  %s3840_s24 = smov 0   ;;  %s3842_s25 = smov 0  }
   0x5   :  { %s3844_s26 = smov 0   ;;  %s3846_s27 = smov 0  }
   0x6 LB: > { %s3861_s28 = sadd.s32 4294967295, %s3783_s27   ;;  %s2818_s29 = sadd.s32 4294967294, %s3783_s27   ;;  %s3783_s27 = sphi %s3846_s27, %s4196_s27   ;;  %s3779_s26 = sphi %s3844_s26, %s4195_s26   ;;  %s3775_s25 = sphi %s3842_s25, %s4194_s25   ;;  %s3771_s24 = sphi %s3840_s24, %s4193_s24  }
   0x7   : > { %s3865_s30 = sadd.s32 1, %s3783_s27   ;;  %s192_s8 = sadd.s32 1, %s3779_s26 }
   0x8   : > { %s189_s9 = ssub.s32 %s3783_s27, %s3865_s30  ;;  %p202_p0 = scmp.ne.s32.totalorder %s3779_s26, %s3775_s25 }
   0x9   : > { %p190_p1 = scmp.eq.s32.totalorder %s189_s9, 0  ;;  %p203_p2 = scmp.eq.s32.totalorder %s3861_s28, 1 }
   0xa   : > { %p208_p3 = scmp.ne.s32.totalorder %s3775_s25, %s3771_s24  ;;  %p209_p4 = scmp.eq.s32.totalorder %s2818_s29, 1 }
   0xb   : > { %s3876_s10 = scalar_select %p190_p1, %s3779_s26, %s192_s8  }
   0xc   : > { %p3878_p5 = por %p203_p2, %p202_p0  ;;  %p3882_p6 = por %p209_p4, %p208_p3 }
   0xd   : > { %p2819_p7 = scmp.ge.s32.totalorder %s3783_s27, 1  ;;  %p216_p8 = scmp.lt.s32.totalorder %s3783_s27, 3 }
   0xe   : > { %s4183_s12 = scalar_select %p3882_p6, 1, 0 }
   0xf   : > { %p4181_p9 = scmp.eq.s32.totalorder %s3861_s28, 0  ;;  %p3889_p10 = pnand %p2819_p7, %p216_p8 }
  0x10   : > { %s3785_s14 = smov [#allocation5]   ;;  %s3786_s17 = smov [#allocation2]  }
  0x11   : > { %s241_s15 = sshll.u32 %s3785_s14, 4  ;;  %p3285_p11 = pneg %p3889_p10  ;;  %s242_s15 = int_to_ptr.vmem [resolvable:$true] %s241_s15 }
  0x12   : > { %s228_s18 = sshll.u32 %s3786_s17, 4  ;;  %s3618_s19 = scalar_lea.vmem %s242_s15, 3072  ;;  %s229_s18 = int_to_ptr.vmem [resolvable:$true] %s228_s18 }
  0x13   : > { %p3897_p12 = pnand %p4181_p9, %p3285_p11  ;;  %p3619_p0 = scmp.ne.s32.totalorder %s242_s15, %s3618_s19 }
  0x14   : > { %p3626_p3 = scmp.lt.s32.totalorder %s242_s15, %s242_s15  ;;  %p3627_p4 = scmp.lt.s32.totalorder %s3618_s19, %s3618_s19 }
  0x15   : > { %p3609_p13 = pneg %p3897_p12 }
  0x16   : > { %p3628_p7 = por %p3627_p4, %p3626_p3 }
  0x17   : > { %p3621_p1 = pnand %p3619_p0, %p3609_p13 }
  0x19   : > { %p3622_p2 = pneg %p3621_p1 }
  0x1b   : > { %p3629_p8 = pnand %p3628_p7, %p3622_p2 }
  0x1d   : > { %3632 = shalt.err (!%p3629_p8)
}
  0x1e   : > { %s3787_s20 = smov 768   ;;  %s3788_s21 = smov 48  }
  0x1f   : > { %3291 = dma.hbm_to_vmem [thread:$0]  (!%p3897_p12), %s4177_s4, 3072, %s242_s15, [#allocation6], %s3787_s20, %s3787_s20, %s3788_s21  }
  0x20   : > { %s3644_s29 = scalar_lea.vmem %s229_s18, 1024  ;;  %p3652_p9 = scmp.lt.s32.totalorder %s229_s18, %s229_s18 }
  0x21   : > { %p3645_p11 = scmp.ne.s32.totalorder %s229_s18, %s3644_s29  ;;  %p3653_p6 = scmp.lt.s32.totalorder %s3644_s29, %s3644_s29 }
  0x23   : > { %p3647_p0 = pnand %p3645_p11, %p3609_p13  ;;  %p3654_p3 = por %p3653_p6, %p3652_p9 }
  0x25   : > { %p3648_p1 = pneg %p3647_p0 }
  0x27   : > { %p3655_p2 = pnand %p3654_p3, %p3648_p1 }
  0x29   : > { %3658 = shalt.err (!%p3655_p2)
}
  0x2a   : > { %s3789_s8 = smov 64   ;;  %s3790_s9 = smov 4  }
  0x2b   : > { %3288 = dma.hbm_to_vmem [thread:$0]  (!%p3897_p12), %s4176_s3, 1024, %s229_s18, [#allocation3], %s3789_s8, %s3789_s8, %s3790_s9  }
  0x2c   : > { %s3791_s17 = smov [#allocation7]  }
  0x2d   : > { %s254_s19 = sshll.u32 %s3791_s17, 4  ;;  %s255_s19 = int_to_ptr.vmem [resolvable:$true] %s254_s19 }
  0x2e   : > { %s3670_s20 = scalar_lea.vmem %s255_s19, 12288  ;;  %p3678_p7 = scmp.lt.s32.totalorder %s255_s19, %s255_s19 }
  0x2f   : > { %p3671_p4 = scmp.ne.s32.totalorder %s255_s19, %s3670_s20  ;;  %p3679_p8 = scmp.lt.s32.totalorder %s3670_s20, %s3670_s20 }
  0x31   : > { %p3673_p6 = pnand %p3671_p4, %p3609_p13  ;;  %p3680_p11 = por %p3679_p8, %p3678_p7 }
  0x33   : > { %p3674_p9 = pneg %p3673_p6 }
  0x35   : > { %p3681_p0 = pnand %p3680_p11, %p3674_p9 }
  0x37   : > { %3684 = shalt.err (!%p3681_p0)
}
  0x38   : > { %s3792_s21 = smov 384   ;;  %s3793_s22 = smov 24  }
  0x39   : > { %3294 = dma.hbm_to_vmem [thread:$0]  (!%p3897_p12), %s4178_s5, 12288, %s255_s19, [#allocation6], %s3792_s21, %s3792_s21, %s3793_s22  }
  0x3a   : > { %s3794_s29 = smov [#allocation8]  }
  0x3b   : > { %s267_s14 = sshll.u32 %s3794_s29, 4  ;;  %s268_s14 = int_to_ptr.vmem [resolvable:$true] %s267_s14 }
  0x3c   : > { %s3696_s15 = scalar_lea.vmem %s268_s14, 8192  ;;  %p3704_p4 = scmp.lt.s32.totalorder %s268_s14, %s268_s14 }
  0x3d   : > { %p3697_p1 = scmp.ne.s32.totalorder %s268_s14, %s3696_s15  ;;  %p3705_p6 = scmp.lt.s32.totalorder %s3696_s15, %s3696_s15 }
  0x3f   : > { %p3699_p3 = pnand %p3697_p1, %p3609_p13  ;;  %p3706_p9 = por %p3705_p6, %p3704_p4 }
  0x41   : > { %p3700_p2 = pneg %p3699_p3 }
  0x43   : > { %p3707_p7 = pnand %p3706_p9, %p3700_p2 }
  0x45   : > { %3710 = shalt.err (!%p3707_p7)
}
  0x46   : > { %3297 = dma.hbm_to_vmem [thread:$0]  (!%p3897_p12), %s4179_s6, 8192, %s268_s14, [#allocation9], %s3789_s8, %s3789_s8, %s3790_s9  }
  0x47   : > { %304 = sbr.rel (%p3889_p10) target bundleno = 5582 (0x15ce), region = 48  ;;  %p4186_p13 = scmp.eq.s32.totalorder (!%p3889_p10), %s3861_s28, 0 }
  0x4c   : > { %3754 = dma.done.wait (%p4186_p13), [#allocation3], 1024   ;;  %p4187_p8 = pmov %p4186_p13 }
  0x4e   : > { %3756 = vsyncadd (%p4187_p8), [#allocation3], 4294966272  ;;  %p4188_p11 = pmov %p4187_p8 }
  0x4f   : > { %p4189_p0 = pmov %p4187_p8 }
  0x50   : > { %3758 = dma.done.wait (%p4188_p11), [#allocation6], 15360  }
  0x51   : > { %3760 = vsyncadd (%p4189_p0), [#allocation6], 4294951936  ;;  %p4190_p1 = pmov %p4189_p0 }
  0x52   : > { %p4191_p12 = pmov %p4189_p0 }
  0x53   : > { %3762 = dma.done.wait (%p4190_p1), [#allocation9], 8192  }
  0x54   : > { %3764 = vsyncadd (%p4191_p12), [#allocation9], 4294959104  ;;  %p354_p10 = scmp.lt.s32.totalorder %s3861_s28, 1  ;;  %v3795_v0 = vmov 0   ;;  %v3796_v1 = vmov 0.0   ;;  %vm3797_vm0 = vmmov 0   ;;  %v367_v11 = vlaneseq }
  0x55   : > { %3357 = vset.pattern.permute.xlu0 %v3795_v0  ;;  %3117 = vmatprep.subr.bf16.mxu0 %v3796_v1  ;;  %v3359_v3 = vld [vmem:[#allocation2 + $0x38] sm:$0xff]   ;;  %v3360_v4 = vld [vmem:[#allocation2 + $0x30] sm:$0xff]   ;;  %v3361_v5 = vld [vmem:[#allocation2 + $0x28] sm:$0xff]   ;;  %v3798_v14 = vmov 1.0|1.0   ;;  %vm1080_vm4 = vcmask 1043456  }
  0x56   : > { %s355_s13 = scalar_select %p354_p10, %s3861_s28, 1  ;;  %930 = vmatprep.mubr.bf16.mxu1 %v3795_v0  ;;  %3358 = vset.pattern.permute.xlu1 %v3795_v0  ;;  %v3362_v6 = vld [vmem:[#allocation2 + $0x20] sm:$0xff]   ;;  %v3363_v7 = vld [vmem:[#allocation2 + $0x18] sm:$0xff]   ;;  %v3364_v8 = vld [vmem:[#allocation2 + $0x10] sm:$0xff]   ;;  %v368_v12 = vand.u32 127, %v367_v11  ;;  %vm1064_vm5 = vcmask 64512  }
  0x57   : > { %3133 = vmatprep.mubr.msk.bf16.mxu0 %vm3797_vm0, %v3796_v1  ;;  %3118 = vmatpush3.bf16.msra.mxu0 %v3359_v3  ;;  %v3365_v9 = vld [vmem:[#allocation2 + $0x8] sm:$0xff]   ;;  %v3366_v10 = vld [vmem:[#allocation2] sm:$0xff]   ;;  %v3370_v23 = vld [vmem:[#allocation7 + $0x158] ss:$24 sps:$4 sm:$0xff]   ;;  %vm2669_vm6 = vcmask 7168   ;;  %s352_s17 = sand.u32 1, %s3775_s25  }
  0x58   : > { %s3961_s16 = sshll.u32 %s355_s13, 3  ;;  %3119 = vmatprep.subr.bf16.mxu0 %v3796_v1  ;;  %v398_v15 = vld [vmem:[#allocation5] sm:$0xff]  ;;  %v3367_v21 = vld [vmem:[#allocation7 + $0x154] ss:$24 sps:$4 sm:$0xff]   ;;  %v3369_v22 = vld [vmem:[#allocation7 + $0x150] ss:$24 sps:$4 sm:$0xff]  }
  0x59   : > { %s357_s20 = scalar_lea.vmem %s4173_s0, %s3961_s16  ;;  %v3372_v24 = vld [vmem:[#allocation7 + $0x15c] ss:$24 sps:$4 sm:$0xff]   ;;  %898 = vmatprep.subr.bf16.mxu1 %v3367_v21  ;;  %v3378_v26 = vld [vmem:[#allocation7 + $0x12c] ss:$24 sps:$4 sm:$0xff]   ;;  %v3375_v27 = vld [vmem:[#allocation7 + $0x120] ss:$24 sps:$4 sm:$0xff]   ;;  %s361_s18 = scalar_lea.vmem %s4174_s1, %s3961_s16 }
  0x5a   : > { %v373_v2 = vld [vmem:[%s357_s20] sm:$0xff]  ;;  %899 = vmatpush1.bf16.msra.mxu1 %v3369_v22  ;;  %vm369_vm3 = vcmp.lt.s32.totalorder %v368_v12, 32  ;;  %v3379_v35 = vld [vmem:[#allocation7 + $0xf4] ss:$24 sps:$4 sm:$0xff]   ;;  %v3381_v36 = vld [vmem:[#allocation7 + $0xf0] ss:$24 sps:$4 sm:$0xff]   ;;  %s365_s14 = scalar_lea.vmem %s4175_s2, %s3961_s16 }
  0x5b   : > { %376 = vperm.xlu0 %3357, %v373_v2   ;;  %3120 = vmatpush3.bf16.msra.mxu0 %v3360_v4  ;;  %v3373_v25 = vld [vmem:[#allocation7 + $0x124] ss:$24 sps:$4 sm:$0xff]   ;;  %v3376_v28 = vld [vmem:[#allocation7 + $0x128] ss:$24 sps:$4 sm:$0xff]   ;;  %v3979_v31 = vsel %vm369_vm3, 1.0, %v3796_v1  ;;  %s3009_s19 = sshll.u32 %s3861_s28, 4 }
  0x5c   : > { %3121 = vmatprep.subr.bf16.mxu0 %v3796_v1  ;;  %900 = vmatprep.subr.bf16.mxu1 %v3373_v25  ;;  %v3384_v37 = vld [vmem:[#allocation7 + $0xfc] ss:$24 sps:$4 sm:$0xff]   ;;  %v3382_v38 = vld [vmem:[#allocation7 + $0xf8] ss:$24 sps:$4 sm:$0xff]   ;;  %v3388_v41 = vld [vmem:[#allocation7 + $0xc8] ss:$24 sps:$4 sm:$0xff]   ;;  %s2696_s20 = scalar_lea.hbm %s4180_s7, %s3009_s19 }
  0x5d   : > { %v3385_v39 = vld [vmem:[#allocation7 + $0xc4] ss:$24 sps:$4 sm:$0xff]   ;;  %v3387_v40 = vld [vmem:[#allocation7 + $0xc0] ss:$24 sps:$4 sm:$0xff]   ;;  %v3391_v43 = vld [vmem:[#allocation7 + $0x94] ss:$24 sps:$4 sm:$0xff]  }
  0x5e   : > { %901 = vmatpush1.bf16.msra.mxu1 %v3375_v27  ;;  %v3390_v42 = vld [vmem:[#allocation7 + $0xcc] ss:$24 sps:$4 sm:$0xff]   ;;  %v3393_v44 = vld [vmem:[#allocation7 + $0x90] ss:$24 sps:$4 sm:$0xff]   ;;  %v3396_v45 = vld [vmem:[#allocation7 + $0x9c] ss:$24 sps:$4 sm:$0xff]  }
  0x5f   : > { %3122 = vmatpush3.bf16.msra.mxu0 %v3361_v5  ;;  %902 = vmatprep.subr.bf16.mxu1 %v3379_v35  ;;  %v3394_v46 = vld [vmem:[#allocation7 + $0x98] ss:$24 sps:$4 sm:$0xff]   ;;  %v3397_v47 = vld [vmem:[#allocation7 + $0x64] ss:$24 sps:$4 sm:$0xff]   ;;  %v3400_v50 = vld [vmem:[#allocation7 + $0x68] ss:$24 sps:$4 sm:$0xff]  }
  0x60   : > { %3123 = vmatprep.subr.bf16.mxu0 %v3796_v1  ;;  %v3402_v48 = vld [vmem:[#allocation7 + $0x6c] ss:$24 sps:$4 sm:$0xff]   ;;  %v3399_v49 = vld [vmem:[#allocation7 + $0x60] ss:$24 sps:$4 sm:$0xff]   ;;  %v3408_v52 = vld [vmem:[#allocation7 + $0x3c] ss:$24 sps:$4 sm:$0xff]  }
  0x61   : > { %v3403_v51 = vld [vmem:[#allocation7 + $0x34] ss:$24 sps:$4 sm:$0xff]   ;;  %v3405_v53 = vld [vmem:[#allocation7 + $0x30] ss:$24 sps:$4 sm:$0xff]   ;;  %v3409_v55 = vld [vmem:[#allocation7 + $0x4] ss:$24 sps:$4 sm:$0xff]  }
  0x62   : > { %903 = vmatpush1.bf16.msra.mxu1 %v3381_v36  ;;  %v3406_v54 = vld [vmem:[#allocation7 + $0x38] ss:$24 sps:$4 sm:$0xff]   ;;  %v3414_v56 = vld [vmem:[#allocation7 + $0xc] ss:$24 sps:$4 sm:$0xff]   ;;  %v3412_v58 = vld [vmem:[#allocation7 + $0x8] ss:$24 sps:$4 sm:$0xff]  }
  0x63   : > { %3124 = vmatpush3.bf16.msra.mxu0 %v3362_v6  ;;  %904 = vmatprep.subr.bf16.mxu1 %v3385_v39  ;;  %v3411_v57 = vld [vmem:[#allocation7] ss:$24 sps:$4 sm:$0xff]   ;;  %v3417_v59 = vld [vmem:[#allocation7 + $0x164] ss:$24 sps:$4 sm:$0xff]   ;;  %v487_v2 = vld [vmem:[#allocation5 + $0x30] ss:$0 sm:$0xff] }
  0x64   : > { %3125 = vmatprep.subr.bf16.mxu0 %v3796_v1  ;;  %v488_v4 = vld [vmem:[#allocation5 + $0x31] ss:$0 sm:$0xff]  ;;  %v3433_v21 = vld [vmem:[#allocation7 + $0x40] ss:$24 sps:$4 sm:$0xff]   ;;  %v3438_v22 = vld [vmem:[#allocation7 + $0x14] ss:$24 sps:$4 sm:$0xff]  }
  0x65   : > { %v504_v25 = vld [vmem:[#allocation5 + $0x60] ss:$8 sm:$0xf]  ;;  %s353_s13 = scalar_lea.vmem [#allocation10], %s352_s17  ;;  %s2686_s21 = scalar_lea.sflag [#allocation4], %s352_s17 }
  0x66   : > { %905 = vmatpush1.bf16.msra.mxu1 %v3387_v40  ;;  %s2698_s16 = sshll.u32 %s353_s13, 4  ;;  %s2699_s16 = int_to_ptr.vmem [resolvable:$true] %s2698_s16 }
  0x67   : > { %3126 = vmatpush3.bf16.msra.mxu0 %v3363_v7  ;;  %906 = vmatprep.subr.bf16.mxu1 %v3391_v43  ;;  %v3415_v7 = vld [vmem:[#allocation7 + $0x160] ss:$24 sps:$4 sm:$0xff]   ;;  %s3711_s22 = scalar_lea.vmem %s2699_s16, 16 }
  0x68   : > { %3127 = vmatprep.subr.bf16.mxu0 %v3796_v1  ;;  %p3712_p3 = scmp.ne.s32.totalorder %s2699_s16, %s3711_s22 }
  0x6a   : > { %907 = vmatpush1.bf16.msra.mxu1 %v3393_v44  ;;  %p3713_p2 = pnand %p3712_p3, %p3878_p5 }
  0x6b   : > { %3128 = vmatpush3.bf16.msra.mxu0 %v3364_v8  ;;  %908 = vmatprep.subr.bf16.mxu1 %v3397_v47 }
  0x6c   : > { %3129 = vmatprep.subr.bf16.mxu0 %v3796_v1  ;;  %p3714_p4 = pneg %p3713_p2 }
  0x6e   : > { %909 = vmatpush1.bf16.msra.mxu1 %v3399_v49 }
  0x6f   : > { %3130 = vmatpush3.bf16.msra.mxu0 %v3365_v9  ;;  %910 = vmatprep.subr.bf16.mxu1 %v3403_v51  ;;  %v3420_v9 = vld [vmem:[#allocation7 + $0x134] ss:$24 sps:$4 sm:$0xff]  }
  0x70   : > { %3131 = vmatprep.subr.bf16.mxu0 %v3796_v1 }
  0x72   : > { %911 = vmatpush1.bf16.msra.mxu1 %v3405_v53  ;;  %v4011_v53 = vld [vmem:[%s361_s18] sm:$0xff]  ;;  %s3799_s18 = smov [#allocation10]  }
  0x73   : > { %3132 = vmatpush3.bf16.msra.mxu0 %v3366_v10  ;;  %912 = vmatprep.subr.bf16.mxu1 %v3409_v55  ;;  %v3418_v10 = vld [vmem:[#allocation7 + $0x130] ss:$24 sps:$4 sm:$0xff]   ;;  %s3715_s23 = sshll.u32 %s3799_s18, 4  ;;  %s3716_s23 = int_to_ptr.vmem [resolvable:$false] %s3715_s23 }
  0x74   : > { %939 = vmatprep.subr.bf16.mxu0 %v3372_v24  ;;  %v3991_v24 = vshrl.u32 %v367_v11, 7  ;;  %s3717_s28 = scalar_lea.vmem %s3716_s23, 32  ;;  %p3718_p6 = scmp.lt.s32.totalorder %s2699_s16, %s3716_s23 }
  0x75   : > { %p3719_p9 = scmp.lt.s32.totalorder %s3717_s28, %s3711_s22 }
  0x76   : > { %913 = vmatpush1.bf16.msra.mxu1 %v3411_v57  ;;  %v646_v44 = vsub.s32 4, %v3991_v24 }
  0x77   : > { %980 = vmatprep.subr.bf16.mxu1 %v3417_v59  ;;  %p3720_p7 = por %p3719_p9, %p3718_p6 }
  0x79   : > { %p3721_p13 = pnand %p3720_p7, %p3714_p4 }
  0xd6   : > { %v377_v13 = vpop.permute.xlu0 %376 }
  0xd7   : > { %vm378_vm1 = vcmp.eq.s32.totalorder %v368_v12, %v377_v13  ;;  %v3423_v12 = vld [vmem:[#allocation7 + $0x104] ss:$24 sps:$4 sm:$0xff]   ;;  %v3421_v13 = vld [vmem:[#allocation7 + $0x100] ss:$24 sps:$4 sm:$0xff]  }
  0xd8   : > { %vm2843_vm2 = vmpackc.low %vm378_vm1, %vm378_vm1 }
  0xd9   : > { %3134 = vmatmul.mubr.msk.bf16.vlgmr.msra.gmra.mxu0 %vm2843_vm2, %v3798_v14  ;;  %v3426_v14 = vld [vmem:[#allocation7 + $0xd4] ss:$24 sps:$4 sm:$0xff]  }
  0xda   : > { %971 = vmatprep.mubr.bf16.mxu0 %v3795_v0  ;;  %940 = vmatpush1.bf16.msra.mxu0 %v3370_v23  ;;  %v3436_v23 = vld [vmem:[#allocation7 + $0x10] ss:$24 sps:$4 sm:$0xff]  }
  0xdb   : > { %941 = vmatprep.subr.bf16.mxu0 %v3378_v26  ;;  %v505_v26 = vld [vmem:[#allocation5 + $0x60] ss:$8 sm:$0x30] }
  0xdc   : > { %v506_v27 = vor.u32 %v505_v26, %v504_v25 }
  0xde   : > { %942 = vmatpush1.bf16.msra.mxu0 %v3376_v28  ;;  %v638_v28 = vsub.s32 2, %v3991_v24 }
  0xdf   : > { %943 = vmatprep.subr.bf16.mxu0 %v3384_v37 }
  0xe2   : > { %944 = vmatpush1.bf16.msra.mxu0 %v3382_v38 }
  0xe3   : > { %945 = vmatprep.subr.bf16.mxu0 %v3390_v42 }
  0xe6   : > { %946 = vmatpush1.bf16.msra.mxu0 %v3388_v41 }
  0xe7   : > { %947 = vmatprep.subr.bf16.mxu0 %v3396_v45  ;;  %v647_v45 = vrot.slane %v506_v27, %v646_v44 }
  0xea   : > { %948 = vmatpush1.bf16.msra.mxu0 %v3394_v46 }
  0xeb   : > { %949 = vmatprep.subr.bf16.mxu0 %v3402_v48 }
  0xee   : > { %950 = vmatpush1.bf16.msra.mxu0 %v3400_v50 }
  0xef   : > { %951 = vmatprep.subr.bf16.mxu0 %v3408_v52 }
  0xf2   : > { %952 = vmatpush1.bf16.msra.mxu0 %v3406_v54 }
  0xf3   : > { %953 = vmatprep.subr.bf16.mxu0 %v3414_v56 }
  0xf6   : > { %954 = vmatpush1.bf16.msra.mxu0 %v3412_v58 }
 0x199   : > { %v481_v16 = vpop.f32.mrf.mxu0 }
 0x19a   : > { %v482_v17 = vadd.f32 %v481_v16, %v398_v15  ;;  %v3424_v15 = vld [vmem:[#allocation7 + $0xd0] ss:$24 sps:$4 sm:$0xff]   ;;  %v3429_v16 = vld [vmem:[#allocation7 + $0xa4] ss:$24 sps:$4 sm:$0xff]  }
 0x19b   : > { %v3135_v18 = vpop.f32.mrf.mxu0 }
 0x19c   : > { %489 = vadd.xlane.f32.xlu0 %v482_v17  ;;  %v3432_v18 = vld [vmem:[#allocation7 + $0x74] ss:$24 sps:$4 sm:$0xff]  }
 0x19d   : > { %v484_v19 = vpop.f32.mrf.mxu0 }
 0x19e   : > { %v3430_v19 = vld [vmem:[#allocation7 + $0x70] ss:$24 sps:$4 sm:$0xff]  }
 0x19f   : > { %v3136_v20 = vpop.f32.mrf.mxu0 }
 0x1a0   : > { %v3435_v20 = vld [vmem:[#allocation7 + $0x44] ss:$24 sps:$4 sm:$0xff]  }
 0x225   : > { %v490_v29 = vpop.xlane.xlu0 %489 }
 0x226   : > { %v491_v30 = vmul.f32 0.03125, %v490_v29  ;;  %v639_v29 = vrot.slane %v506_v27, %v638_v28 }
 0x228   : > { %v492_v32 = vsub.f32 %v482_v17, %v491_v30  ;;  %v3427_v17 = vld [vmem:[#allocation7 + $0xa0] ss:$24 sps:$4 sm:$0xff]   ;;  %v630_v30 = vsub.s32 0, %v3991_v24 }
 0x22a   : > { %v493_v33 = vmul.f32 %v3979_v31, %v492_v32  ;;  %v631_v35 = vrot.slane %v506_v27, %v630_v30 }
 0x22c   : > { %v494_v34 = vmul.f32 %v493_v33, %v493_v33 }
 0x22e   : > { %495 = vadd.xlane.f32.xlu1 %v494_v34 }
 0x2b7   : > { %v496_v60 = vpop.xlane.xlu1 %495 }
 0x2b8   : > { %v497_v61 = vmul.f32 0.03125, %v496_v60 }
 0x2ba   : > { %v498_v62 = vadd.f32 1e-12, %v497_v61 }
 0x2bc   : > { %3575 = vrsqrt.f32 %v498_v62 }
 0x2c9   : > { %v3576_v63 = vpop.eup %3575 }
 0x2ca   : > { %v500_v3 = vmul.f32 %v3576_v63, %v493_v33 }
 0x2cc   : > { %v501_v5 = vmul.f32 %v500_v3, %v487_v2 }
 0x2ce   : > { %v3982_v6 = vadd.f32 %v501_v5, %v488_v4  ;;  %v642_v4 = vsub.s32 3, %v3991_v24 }
 0x2d0   : > { %v626_v8 = vpack.c.bf16 %v3982_v6, %v3982_v6  ;;  %v643_v5 = vrot.slane %v506_v27, %v642_v4 }
 0x2d2   : > { %931 = vmatmul.mubr.bf16.vlgmr.msra.gmra.mxu1 %v626_v8  ;;  %972 = vmatmul.mubr.bf16.vlgmr.msra.gmra.mxu0 %v626_v8 }
 0x2d3   : > { %981 = vmatpush1.bf16.msra.mxu1 %v3415_v7  ;;  %1012 = vmatprep.mubr.bf16.mxu1 %v3795_v0  ;;  %v650_v7 = vsub.s32 5, %v3991_v24 }
 0x2d4   : > { %982 = vmatprep.subr.bf16.mxu1 %v3420_v9 }
 0x2d7   : > { %983 = vmatpush1.bf16.msra.mxu1 %v3418_v10 }
 0x2d8   : > { %984 = vmatprep.subr.bf16.mxu1 %v3423_v12  ;;  %v651_v12 = vrot.slane %v506_v27, %v650_v7 }
 0x2db   : > { %985 = vmatpush1.bf16.msra.mxu1 %v3421_v13 }
 0x2dc   : > { %986 = vmatprep.subr.bf16.mxu1 %v3426_v14 }
 0x2df   : > { %987 = vmatpush1.bf16.msra.mxu1 %v3424_v15 }
 0x2e0   : > { %988 = vmatprep.subr.bf16.mxu1 %v3429_v16 }
 0x2e3   : > { %989 = vmatpush1.bf16.msra.mxu1 %v3427_v17 }
 0x2e4   : > { %990 = vmatprep.subr.bf16.mxu1 %v3432_v18 }
 0x2e7   : > { %991 = vmatpush1.bf16.msra.mxu1 %v3430_v19 }
 0x2e8   : > { %992 = vmatprep.subr.bf16.mxu1 %v3435_v20 }
 0x2eb   : > { %993 = vmatpush1.bf16.msra.mxu1 %v3433_v21 }
 0x2ec   : > { %994 = vmatprep.subr.bf16.mxu1 %v3438_v22 }
 0x2ef   : > { %995 = vmatpush1.bf16.msra.mxu1 %v3436_v23 }
 0x2f0   : > { %3137 = vmatprep.subr.bf16.mxu1 %v3796_v1 }
 0x2f2   : > { %1013 = vmatmul.mubr.bf16.vlgmr.msra.gmra.mxu1 %v626_v8  ;;  %v634_v8 = vsub.s32 1, %v3991_v24 }
 0x2f3   : > { %3139 = vmatprep.mubr.msk.bf16.mxu1 %vm3797_vm0, %v3796_v1 }
 0x2f4   : > { %v635_v14 = vrot.slane %v506_v27, %v634_v8 }
 0x392   : > { %v932_v32 = vpop.f32.mrf.mxu1  ;;  %v973_v33 = vpop.f32.mrf.mxu0 }
 0x393   : > { %v974_v34 = vadd.f32 %v973_v33, %v639_v29  ;;  %v933_v40 = vadd.f32 %v932_v32, %v631_v35 }
 0x394   : > { %v934_v36 = vpop.f32.mrf.mxu1  ;;  %v975_v37 = vpop.f32.mrf.mxu0 }
 0x395   : > { %v1022_v11 = vpack.c.bf16 %v974_v34, %v974_v34  ;;  %v1021_v43 = vpack.c.bf16 %v933_v40, %v933_v40  ;;  %v976_v10 = vadd.f32 %v975_v37, %v643_v5  ;;  %v935_v18 = vadd.f32 %v934_v36, %v635_v14  ;;  %v3439_v40 = vld [vmem:[#allocation8 + $0x78] sm:$0xff]  }
 0x396   : > { %v936_v38 = vpop.f32.mrf.mxu1  ;;  %v977_v39 = vpop.f32.mrf.mxu0  ;;  %3029 = vmatprep.subr.bf16.mxu0 %v3439_v40  ;;  %v509_v40 = vld [vmem:[#allocation5 + $0x63] ss:$0 sm:$0xff] }
 0x397   : > { %3138 = vmatpush3.bf16.xpose.msra.mxu1 %v1022_v11  ;;  %v1125_v16 = vpack.c.bf16 %v976_v10, %v976_v10  ;;  %v1124_v20 = vpack.c.bf16 %v935_v18, %v935_v18 }
 0x398   : > { %v937_v41 = vpop.f32.mrf.mxu1  ;;  %v978_v42 = vpop.f32.mrf.mxu0  ;;  %3143 = vmatprep.subr.bf16.mxu1 %v3796_v1 }
 0x399   : > { %v3440_v41 = vld [vmem:[#allocation8 + $0x38] sm:$0xff]   ;;  %v3441_v42 = vld [vmem:[#allocation8 + $0x70] sm:$0xff]  }
 0x39a   : > { %3030 = vmatpush3.bf16.msra.mxu0 %v3440_v41 }
 0x39b   : > { %3031 = vmatprep.subr.bf16.mxu0 %v3441_v42 }
 0x39e   : > { %3140 = vmatmul.mubr.bf16.vlgmr.msra.gmra.mxu1 %v1021_v43  ;;  %v3442_v43 = vld [vmem:[#allocation8 + $0x30] sm:$0xff]  }
 0x39f   : > { %3145 = vmatprep.mubr.msk.bf16.mxu1 %vm3797_vm0, %v3796_v1  ;;  %3032 = vmatpush3.bf16.msra.mxu0 %v3442_v43 }
 0x3b2   : > { %v1014_v46 = vpop.f32.mrf.mxu1 }
 0x3b3   : > { %v1015_v47 = vadd.f32 %v1014_v46, %v647_v45  ;;  %v3443_v45 = vld [vmem:[#allocation8 + $0x68] sm:$0xff]  }
 0x3b4   : > { %v1016_v48 = vpop.f32.mrf.mxu1  ;;  %v3444_v46 = vld [vmem:[#allocation8 + $0x28] sm:$0xff]   ;;  %3033 = vmatprep.subr.bf16.mxu0 %v3443_v45  ;;  %v3463_v45 = vld [vmem:[#allocation8 + $0xf8] sm:$0xff]  }
 0x3b5   : > { %v1023_v49 = vpack.c.bf16 %v1015_v47, %v1015_v47  ;;  %v1017_v17 = vadd.f32 %v1016_v48, %v651_v12  ;;  %v3445_v47 = vld [vmem:[#allocation8 + $0x60] sm:$0xff]   ;;  %3034 = vmatpush3.bf16.msra.mxu0 %v3444_v46  ;;  %v3464_v46 = vld [vmem:[#allocation8 + $0xf0] sm:$0xff]  }
 0x3b6   : > { %v1018_v50 = vpop.f32.mrf.mxu1  ;;  %v3446_v48 = vld [vmem:[#allocation8 + $0x20] sm:$0xff]   ;;  %3035 = vmatprep.subr.bf16.mxu0 %v3445_v47  ;;  %v3465_v47 = vld [vmem:[#allocation8 + $0xe8] sm:$0xff]  }
 0x3b7   : > { %v1082_v51 = vsel %vm1080_vm4, %v1023_v49, 0  ;;  %v1126_v19 = vpack.c.bf16 %v1017_v17, %v1017_v17  ;;  %v3447_v49 = vld [vmem:[#allocation8 + $0x58] sm:$0xff]   ;;  %v507_v12 = vld [vmem:[#allocation5 + $0x61] ss:$0 sm:$0xff] }
 0x3b8   : > { %v1019_v52 = vpop.f32.mrf.mxu1  ;;  %3144 = vmatpush3.bf16.msra.mxu1 %v1082_v51  ;;  %v3448_v50 = vld [vmem:[#allocation8 + $0x18] sm:$0xff]   ;;  %v3449_v51 = vld [vmem:[#allocation8 + $0x50] sm:$0xff]  }
 0x3b9   : > { %3149 = vmatprep.subr.bf16.mxu1 %v3796_v1  ;;  %v1183_v21 = vsel %vm1080_vm4, %v1126_v19, 0  ;;  %3036 = vmatpush3.bf16.msra.mxu0 %v3446_v48  ;;  %v3450_v52 = vld [vmem:[#allocation8 + $0x10] sm:$0xff]   ;;  %v3455_v19 = vld [vmem:[#allocation8 + $0xb8] sm:$0xff]   ;;  %v3466_v48 = vld [vmem:[#allocation8 + $0xe0] sm:$0xff]  }
 0x3ba   : > { %3037 = vmatprep.subr.bf16.mxu0 %v3447_v49  ;;  %v3467_v49 = vld [vmem:[#allocation8 + $0xd8] sm:$0xff]  }
 0x3bd   : > { %3038 = vmatpush3.bf16.msra.mxu0 %v3448_v50  ;;  %v3468_v50 = vld [vmem:[#allocation8 + $0xd0] sm:$0xff]  }
 0x3be   : > { %3039 = vmatprep.subr.bf16.mxu0 %v3449_v51  ;;  %v3469_v51 = vld [vmem:[#allocation8 + $0xc8] sm:$0xff]  }
 0x3c1   : > { %3040 = vmatpush3.bf16.msra.mxu0 %v3450_v52  ;;  %v3470_v52 = vld [vmem:[#allocation8 + $0xc0] sm:$0xff]  }
 0x45e   : > { %v1058_v54 = vpop.f32.mrf.mxu1 }
 0x45f   : > { %v1059_v55 = vadd.f32 %v1058_v54, %v4011_v53  ;;  %v3451_v54 = vld [vmem:[#allocation8 + $0x48] sm:$0xff]  }
 0x460   : > { %v3141_v56 = vpop.f32.mrf.mxu1  ;;  %3041 = vmatprep.subr.bf16.mxu0 %v3451_v54  ;;  %v510_v54 = vld [vmem:[#allocation5 + $0x64] ss:$0 sm:$0xff] }
 0x461   : > { %v1065_v57 = vsel %vm1064_vm5, %v1059_v55, -inf }
 0x462   : > { %v1061_v58 = vpop.f32.mrf.mxu1  ;;  %1066 = vmax.xlane.f32.xlu1 %v1065_v57 }
 0x464   : > { %v3142_v59 = vpop.f32.mrf.mxu1 }
 0x4eb   : > { %v1067_v60 = vpop.xlane.xlu1 %1066 }
 0x4ec   : > { %v1068_v61 = vsub.f32 %v1059_v55, %v1067_v60  ;;  %v3452_v55 = vld [vmem:[#allocation8 + $0x8] sm:$0xff]   ;;  %v3453_v60 = vld [vmem:[#allocation8 + $0x40] sm:$0xff]  }
 0x4ed   : > { %3042 = vmatpush3.bf16.msra.mxu0 %v3452_v55 }
 0x4ee   : > { %v1069_v62 = vmul.f32 1.442695, %v1068_v61  ;;  %v3454_v61 = vld [vmem:[#allocation8] sm:$0xff]   ;;  %3043 = vmatprep.subr.bf16.mxu0 %v3453_v60 }
 0x4f0   : > { %3577 = vpow2.f32 %v1069_v62 }
 0x4f1   : > { %3044 = vmatpush3.bf16.msra.mxu0 %v3454_v61 }
 0x4f2   : > { %3181 = vmatprep.subr.bf16.mxu0 %v3796_v1 }
 0x4fd   : > { %v3578_v63 = vpop.eup %3577 }
 0x4fe   : > { %v1071_v2 = vsel %vm1064_vm5, %v3578_v63, 0.0 }
 0x4ff   : > { %1072 = vadd.xlane.f32.xlu1 %v1071_v2 }
 0x588   : > { %v1073_v3 = vpop.xlane.xlu1 %1072 }
 0x589   : > { %3579 = vrcp.f32 %v1073_v3 }
 0x596   : > { %v3580_v9 = vpop.eup %3579 }
 0x597   : > { %v1075_v13 = vmul.f32 %v3580_v9, %v3578_v63 }
 0x599   : > { %v1076_v15 = vpack.c.bf16 %v1075_v13, %v1075_v13 }
 0x59b   : > { %3146 = vmatmul.mubr.msk.bf16.vlgmr.msra.gmra.mxu1 %vm1064_vm5, %v1076_v15 }
 0x59c   : > { %3150 = vmatpush3.bf16.xpose.msra.mxu1 %v1125_v16  ;;  %3151 = vmatprep.mubr.msk.bf16.mxu1 %vm3797_vm0, %v3796_v1 }
 0x59d   : > { %3155 = vmatprep.subr.bf16.mxu1 %v3796_v1 }
 0x5a3   : > { %3152 = vmatmul.mubr.bf16.vlgmr.msra.gmra.mxu1 %v1124_v20  ;;  %v3456_v20 = vld [vmem:[#allocation8 + $0xb0] sm:$0xff]  }
 0x5a4   : > { %3156 = vmatpush3.bf16.msra.mxu1 %v1183_v21  ;;  %3157 = vmatprep.mubr.msk.bf16.mxu1 %vm3797_vm0, %v3796_v1 }
 0x5a5   : > { %3161 = vmatprep.subr.bf16.mxu1 %v3796_v1 }
 0x65b   : > { %v4033_v22 = vpop.f32.mrf.mxu1 }
 0x65c   : > { %v1225_v2 = vpack.c.bf16 %v4033_v22, %v4033_v22 }
 0x65d   : > { %v3147_v23 = vpop.f32.mrf.mxu1 }
 0x65f   : > { %v1121_v25 = vpop.f32.mrf.mxu1 }
 0x661   : > { %v3148_v26 = vpop.f32.mrf.mxu1 }
 0x663   : > { %v1161_v27 = vpop.f32.mrf.mxu1 }
 0x664   : > { %v1162_v29 = vadd.f32 %v1161_v27, %v4011_v53  ;;  %v3457_v27 = vld [vmem:[#allocation8 + $0xa8] sm:$0xff]  }
 0x665   : > { %v3153_v32 = vpop.f32.mrf.mxu1 }
 0x666   : > { %v1167_v33 = vsel %vm1064_vm5, %v1162_v29, -inf  ;;  %v3460_v32 = vld [vmem:[#allocation8 + $0x90] sm:$0xff]  }
 0x667   : > { %1168 = vmax.xlane.f32.xlu1 %v1167_v33  ;;  %v1164_v34 = vpop.f32.mrf.mxu1  ;;  %v3461_v33 = vld [vmem:[#allocation8 + $0x88] sm:$0xff]  }
 0x668   : > { %v3462_v34 = vld [vmem:[#allocation8 + $0x80] sm:$0xff]  }
 0x669   : > { %v3154_v35 = vpop.f32.mrf.mxu1 }
 0x6f0   : > { %v1169_v36 = vpop.xlane.xlu1 %1168 }
 0x6f1   : > { %v1170_v37 = vsub.f32 %v1162_v29, %v1169_v36  ;;  %v3458_v29 = vld [vmem:[#allocation8 + $0xa0] sm:$0xff]  }
 0x6f3   : > { %v1171_v11 = vmul.f32 1.442695, %v1170_v37 }
 0x6f5   : > { %3581 = vpow2.f32 %v1171_v11 }
 0x702   : > { %v3582_v38 = vpop.eup %3581 }
 0x703   : > { %v1173_v39 = vsel %vm1064_vm5, %v3582_v38, 0.0 }
 0x704   : > { %1174 = vadd.xlane.f32.xlu1 %v1173_v39 }
 0x78d   : > { %v1175_v56 = vpop.xlane.xlu1 %1174 }
 0x78e   : > { %3583 = vrcp.f32 %v1175_v56 }
 0x79b   : > { %v3584_v57 = vpop.eup %3583 }
 0x79c   : > { %v1177_v58 = vmul.f32 %v3584_v57, %v3582_v38  ;;  %v508_v38 = vld [vmem:[#allocation5 + $0x62] ss:$0 sm:$0xff] }
 0x79e   : > { %v1178_v59 = vpack.c.bf16 %v1177_v58, %v1177_v58 }
 0x7a0   : > { %3158 = vmatmul.mubr.msk.bf16.vlgmr.msra.gmra.mxu1 %vm1064_vm5, %v1178_v59 }
 0x7a1   : > { %3177 = vmatprep.mubr.msk.bf16.mxu1 %vm3797_vm0, %v3796_v1  ;;  %3162 = vmatpush3.bf16.msra.mxu1 %v3455_v19 }
 0x7a2   : > { %3163 = vmatprep.subr.bf16.mxu1 %v3796_v1 }
 0x7a5   : > { %3164 = vmatpush3.bf16.msra.mxu1 %v3456_v20  ;;  %v3471_v20 = vld [vmem:[#allocation7 + $0x2d0] ss:$24 sps:$4 sm:$0xff]  }
 0x7a6   : > { %3165 = vmatprep.subr.bf16.mxu1 %v3796_v1 }
 0x7a9   : > { %3166 = vmatpush3.bf16.msra.mxu1 %v3457_v27  ;;  %v3477_v27 = vld [vmem:[#allocation7 + $0x2a0] ss:$24 sps:$4 sm:$0xff]  }
 0x7aa   : > { %3167 = vmatprep.subr.bf16.mxu1 %v3796_v1 }
 0x7ad   : > { %3168 = vmatpush3.bf16.msra.mxu1 %v3458_v29  ;;  %v3480_v29 = vld [vmem:[#allocation7 + $0x2a8] ss:$24 sps:$4 sm:$0xff]  }
 0x7ae   : > { %3169 = vmatprep.subr.bf16.mxu1 %v3796_v1 }
 0x860   : > { %v1219_v62 = vpop.f32.mrf.mxu1 }
 0x861   : > { %v1226_v63 = vpack.c.bf16 %v1219_v62, %v1219_v62 }
 0x862   : > { %v3159_v3 = vpop.f32.mrf.mxu1 }
 0x863   : > { %1355 = vmatprep.mubr.bf16.mxu0 %v1226_v63 }
 0x864   : > { %v1222_v5 = vpop.f32.mrf.mxu1  ;;  %1356 = vmatmul.mubr.bf16.vlgmr.msra.gmra.mxu0 %v1225_v2 }
 0x865   : > { %3197 = vmatprep.mubr.msk.bf16.mxu0 %vm3797_vm0, %v3796_v1  ;;  %3182 = vmatpush3.bf16.msra.mxu0 %v3463_v45  ;;  %v3500_v45 = vld [vmem:[#allocation7 + $0x21c] ss:$24 sps:$4 sm:$0xff]  }
 0x866   : > { %v3160_v9 = vpop.f32.mrf.mxu1  ;;  %3183 = vmatprep.subr.bf16.mxu0 %v3796_v1 }
 0x869   : > { %3184 = vmatpush3.bf16.msra.mxu0 %v3464_v46  ;;  %v3495_v46 = vld [vmem:[#allocation7 + $0x210] ss:$24 sps:$4 sm:$0xff]  }
 0x86a   : > { %3185 = vmatprep.subr.bf16.mxu0 %v3796_v1 }
 0x86d   : > { %3186 = vmatpush3.bf16.msra.mxu0 %v3465_v47  ;;  %v3498_v47 = vld [vmem:[#allocation7 + $0x218] ss:$24 sps:$4 sm:$0xff]  }
 0x86e   : > { %3187 = vmatprep.subr.bf16.mxu0 %v3796_v1 }
 0x871   : > { %3188 = vmatpush3.bf16.msra.mxu0 %v3466_v48  ;;  %v3503_v48 = vld [vmem:[#allocation7 + $0x1e4] ss:$24 sps:$4 sm:$0xff]  }
 0x872   : > { %3189 = vmatprep.subr.bf16.mxu0 %v3796_v1 }
 0x875   : > { %3190 = vmatpush3.bf16.msra.mxu0 %v3467_v49  ;;  %v3506_v49 = vld [vmem:[#allocation7 + $0x1ec] ss:$24 sps:$4 sm:$0xff]  }
 0x876   : > { %3191 = vmatprep.subr.bf16.mxu0 %v3796_v1 }
 0x879   : > { %3192 = vmatpush3.bf16.msra.mxu0 %v3468_v50  ;;  %v3501_v50 = vld [vmem:[#allocation7 + $0x1e0] ss:$24 sps:$4 sm:$0xff]  }
 0x87a   : > { %3193 = vmatprep.subr.bf16.mxu0 %v3796_v1 }
 0x87d   : > { %3194 = vmatpush3.bf16.msra.mxu0 %v3469_v51  ;;  %v3504_v51 = vld [vmem:[#allocation7 + $0x1e8] ss:$24 sps:$4 sm:$0xff]  }
 0x87e   : > { %3195 = vmatprep.subr.bf16.mxu0 %v3796_v1 }
 0x881   : > { %3196 = vmatpush3.bf16.msra.mxu0 %v3470_v52  ;;  %v3509_v52 = vld [vmem:[#allocation7 + $0x1b4] ss:$24 sps:$4 sm:$0xff]  }
 0x924   : > { %v3045_v10 = vpop.f32.mrf.mxu0 }
 0x926   : > { %v3046_v13 = vpop.f32.mrf.mxu0 }
 0x927   : > { %v3047_v14 = vadd.f32 %v3046_v13, %v3045_v10  ;;  %v511_v13 = vld [vmem:[#allocation5 + $0x65] ss:$0 sm:$0xff] }
 0x928   : > { %v3048_v15 = vpop.f32.mrf.mxu0 }
 0x929   : > { %v1358_v16 = vadd.f32 %v3047_v14, %v507_v12 }
 0x92a   : > { %v3049_v17 = vpop.f32.mrf.mxu0 }
 0x92b   : > { %v1363_v18 = vadd.f32 %v1358_v16, %v3982_v6  ;;  %v3459_v6 = vld [vmem:[#allocation8 + $0x98] sm:$0xff]  }
 0x92c   : > { %3170 = vmatpush3.bf16.msra.mxu1 %v3459_v6 }
 0x92d   : > { %1364 = vadd.xlane.f32.xlu1 %v1363_v18  ;;  %3171 = vmatprep.subr.bf16.mxu1 %v3796_v1 }
 0x930   : > { %3172 = vmatpush3.bf16.msra.mxu1 %v3460_v32 }
 0x931   : > { %3173 = vmatprep.subr.bf16.mxu1 %v3796_v1 }
 0x934   : > { %3174 = vmatpush3.bf16.msra.mxu1 %v3461_v33 }
 0x935   : > { %3175 = vmatprep.subr.bf16.mxu1 %v3796_v1 }
 0x938   : > { %3176 = vmatpush3.bf16.msra.mxu1 %v3462_v34 }
 0x9b6   : > { %v1365_v21 = vpop.xlane.xlu1 %1364 }
 0x9b7   : > { %v1366_v22 = vmul.f32 0.03125, %v1365_v21  ;;  %v3473_v21 = vld [vmem:[#allocation7 + $0x2d4] ss:$24 sps:$4 sm:$0xff]  }
 0x9b8   : > { %1977 = vmatprep.subr.bf16.mxu1 %v3473_v21  ;;  %v3528_v21 = vld [vmem:[#allocation7 + $0x250] ss:$24 sps:$4 sm:$0xff]  }
 0x9b9   : > { %v1367_v23 = vsub.f32 %v1363_v18, %v1366_v22  ;;  %v3474_v22 = vld [vmem:[#allocation7 + $0x2d8] ss:$24 sps:$4 sm:$0xff]  }
 0x9bb   : > { %v1368_v25 = vmul.f32 %v3979_v31, %v1367_v23  ;;  %v3476_v23 = vld [vmem:[#allocation7 + $0x2dc] ss:$24 sps:$4 sm:$0xff]  }
 0x9bc   : > { %2018 = vmatprep.subr.bf16.mxu0 %v3476_v23  ;;  %v3531_v23 = vld [vmem:[#allocation7 + $0x220] ss:$24 sps:$4 sm:$0xff]  }
 0x9bd   : > { %v1369_v26 = vmul.f32 %v1368_v25, %v1368_v25 }
 0x9bf   : > { %1370 = vadd.xlane.f32.xlu1 %v1369_v26  ;;  %v3482_v26 = vld [vmem:[#allocation7 + $0x2ac] ss:$24 sps:$4 sm:$0xff]  }
 0xa48   : > { %v1371_v35 = vpop.xlane.xlu1 %1370 }
 0xa49   : > { %v1372_v36 = vmul.f32 0.03125, %v1371_v35 }
 0xa4b   : > { %v1373_v37 = vadd.f32 1e-12, %v1372_v36  ;;  %v3485_v36 = vld [vmem:[#allocation7 + $0x274] ss:$24 sps:$4 sm:$0xff]  }
 0xa4d   : > { %3585 = vrsqrt.f32 %v1373_v37  ;;  %v3483_v37 = vld [vmem:[#allocation7 + $0x270] ss:$24 sps:$4 sm:$0xff]  }
 0xa5a   : > { %v3586_v11 = vpop.eup %3585 }
 0xa5b   : > { %v1375_v39 = vmul.f32 %v3586_v11, %v1368_v25  ;;  %v3479_v25 = vld [vmem:[#allocation7 + $0x2a4] ss:$24 sps:$4 sm:$0xff]  }
 0xa5c   : > { %v3488_v11 = vld [vmem:[#allocation7 + $0x27c] ss:$24 sps:$4 sm:$0xff]  }
 0xa5d   : > { %v1376_v41 = vmul.f32 %v1375_v39, %v508_v38  ;;  %v3486_v38 = vld [vmem:[#allocation7 + $0x278] ss:$24 sps:$4 sm:$0xff]  }
 0xa5e   : > { %v3489_v39 = vld [vmem:[#allocation7 + $0x240] ss:$24 sps:$4 sm:$0xff]  }
 0xa5f   : > { %v1377_v42 = vadd.f32 %v1376_v41, %v509_v40  ;;  %v3491_v40 = vld [vmem:[#allocation7 + $0x244] ss:$24 sps:$4 sm:$0xff]   ;;  %v3492_v41 = vld [vmem:[#allocation7 + $0x248] ss:$24 sps:$4 sm:$0xff]  }
 0xa61   : > { %v1378_v43 = vpack.c.bf16 %v1377_v42, %v1377_v42 }
 0xa63   : > { %3178 = vmatmul.mubr.bf16.vlgmr.msra.gmra.mxu1 %v1378_v43  ;;  %v3497_v43 = vld [vmem:[#allocation7 + $0x214] ss:$24 sps:$4 sm:$0xff]  }
 0xa64   : > { %2009 = vmatprep.mubr.bf16.mxu1 %v3795_v0  ;;  %1978 = vmatpush1.bf16.msra.mxu1 %v3471_v20  ;;  %v3530_v20 = vld [vmem:[#allocation7 + $0x254] ss:$24 sps:$4 sm:$0xff]  }
 0xa65   : > { %1979 = vmatprep.subr.bf16.mxu1 %v3479_v25  ;;  %v3536_v25 = vld [vmem:[#allocation7 + $0x1f4] ss:$24 sps:$4 sm:$0xff]  }
 0xa68   : > { %1980 = vmatpush1.bf16.msra.mxu1 %v3477_v27  ;;  %v3537_v27 = vld [vmem:[#allocation7 + $0x1c0] ss:$24 sps:$4 sm:$0xff]  }
 0xa69   : > { %1981 = vmatprep.subr.bf16.mxu1 %v3485_v36 }
 0xa6c   : > { %1982 = vmatpush1.bf16.msra.mxu1 %v3483_v37 }
 0xa6d   : > { %1983 = vmatprep.subr.bf16.mxu1 %v3491_v40 }
 0xa70   : > { %1984 = vmatpush1.bf16.msra.mxu1 %v3489_v39 }
 0xa71   : > { %1985 = vmatprep.subr.bf16.mxu1 %v3497_v43 }
 0xa74   : > { %1986 = vmatpush1.bf16.msra.mxu1 %v3495_v46 }
 0xa75   : > { %1987 = vmatprep.subr.bf16.mxu1 %v3503_v48 }
 0xa78   : > { %1988 = vmatpush1.bf16.msra.mxu1 %v3501_v50 }
 0xa79   : > { %1989 = vmatprep.subr.bf16.mxu1 %v3509_v52 }
 0xb23   : > { %v1461_v55 = vpop.f32.mrf.mxu1 }
 0xb24   : > { %v1462_v56 = vadd.f32 %v1461_v55, %v510_v54  ;;  %v3512_v54 = vld [vmem:[#allocation7 + $0x1bc] ss:$24 sps:$4 sm:$0xff]   ;;  %v3507_v55 = vld [vmem:[#allocation7 + $0x1b0] ss:$24 sps:$4 sm:$0xff]  }
 0xb25   : > { %v3179_v57 = vpop.f32.mrf.mxu1  ;;  %1990 = vmatpush1.bf16.msra.mxu1 %v3507_v55 }
 0xb26   : > { %v1467_v58 = vmul.f32 %v1462_v56, %v1462_v56  ;;  %v3515_v57 = vld [vmem:[#allocation7 + $0x184] ss:$24 sps:$4 sm:$0xff]  }
 0xb27   : > { %v1464_v59 = vpop.f32.mrf.mxu1  ;;  %1991 = vmatprep.subr.bf16.mxu1 %v3515_v57 }
 0xb28   : > { %v1468_v60 = vmul.f32 %v1467_v58, %v1462_v56  ;;  %v3518_v58 = vld [vmem:[#allocation7 + $0x18c] ss:$24 sps:$4 sm:$0xff]   ;;  %v3513_v59 = vld [vmem:[#allocation7 + $0x180] ss:$24 sps:$4 sm:$0xff]  }
 0xb29   : > { %v3180_v61 = vpop.f32.mrf.mxu1  ;;  %1992 = vmatpush1.bf16.msra.mxu1 %v3513_v59 }
 0xb2a   : > { %v1469_v62 = vmul.f32 0.044715, %v1468_v60  ;;  %v3516_v60 = vld [vmem:[#allocation7 + $0x188] ss:$24 sps:$4 sm:$0xff]   ;;  %v3521_v61 = vld [vmem:[#allocation7 + $0x2e4] ss:$24 sps:$4 sm:$0xff]  }
 0xb2b   : > { %2059 = vmatprep.subr.bf16.mxu1 %v3521_v61 }
 0xb2c   : > { %v1470_v63 = vadd.f32 %v1469_v62, %v1462_v56 }
 0xb2e   : > { %v1471_v2 = vmul.f32 0.7978846, %v1470_v63 }
 0xb30   : > { %3587 = vtanh.f32 %v1471_v2 }
 0xb3d   : > { %v3588_v3 = vpop.eup %3587 }
 0xb3e   : > { %v1473_v5 = vadd.f32 1.0, %v3588_v3 }
 0xb40   : > { %v1474_v9 = vmul.f32 0.5, %v1473_v5  ;;  %v512_v5 = vld [vmem:[#allocation5 + $0x66] ss:$0 sm:$0xff] }
 0xb42   : > { %v1475_v10 = vmul.f32 %v1474_v9, %v1462_v56  ;;  %v3510_v56 = vld [vmem:[#allocation7 + $0x1b8] ss:$24 sps:$4 sm:$0xff]  }
 0xb44   : > { %v1476_v12 = vpack.c.bf16 %v1475_v10, %v1475_v10  ;;  %v513_v10 = vld [vmem:[#allocation5 + $0x67] ss:$0 sm:$0xff] }
 0xb46   : > { %3198 = vmatmul.mubr.bf16.vlgmr.msra.gmra.mxu0 %v1476_v12 }
 0xb47   : > { %2050 = vmatprep.mubr.bf16.mxu0 %v3795_v0  ;;  %2019 = vmatpush1.bf16.msra.mxu0 %v3474_v22  ;;  %v3533_v22 = vld [vmem:[#allocation7 + $0x224] ss:$24 sps:$4 sm:$0xff]  }
 0xb48   : > { %2020 = vmatprep.subr.bf16.mxu0 %v3482_v26  ;;  %v3534_v26 = vld [vmem:[#allocation7 + $0x1f0] ss:$24 sps:$4 sm:$0xff]  }
 0xb4b   : > { %2021 = vmatpush1.bf16.msra.mxu0 %v3480_v29  ;;  %v3542_v29 = vld [vmem:[#allocation7 + $0x194] ss:$24 sps:$4 sm:$0xff]  }
 0xb4c   : > { %2022 = vmatprep.subr.bf16.mxu0 %v3488_v11 }
 0xb4f   : > { %2023 = vmatpush1.bf16.msra.mxu0 %v3486_v38 }
 0xc06   : > { %v1559_v14 = vpop.f32.mrf.mxu0 }
 0xc07   : > { %v1560_v15 = vadd.f32 %v1559_v14, %v511_v13  ;;  %v3519_v14 = vld [vmem:[#allocation7 + $0x2e0] ss:$24 sps:$4 sm:$0xff]  }
 0xc08   : > { %v3199_v16 = vpop.f32.mrf.mxu0 }
 0xc09   : > { %v1565_v17 = vadd.f32 %v1560_v15, %v1377_v42  ;;  %v3494_v42 = vld [vmem:[#allocation7 + $0x24c] ss:$24 sps:$4 sm:$0xff]  }
 0xc0a   : > { %v1562_v18 = vpop.f32.mrf.mxu0  ;;  %2024 = vmatprep.subr.bf16.mxu0 %v3494_v42  ;;  %v3524_v16 = vld [vmem:[#allocation7 + $0x2b4] ss:$24 sps:$4 sm:$0xff]  }
 0xc0b   : > { %1566 = vadd.xlane.f32.xlu1 %v1565_v17  ;;  %2025 = vmatpush1.bf16.msra.mxu0 %v3492_v41  ;;  %v3527_v18 = vld [vmem:[#allocation7 + $0x284] ss:$24 sps:$4 sm:$0xff]  }
 0xc0c   : > { %v3200_v19 = vpop.f32.mrf.mxu0  ;;  %2026 = vmatprep.subr.bf16.mxu0 %v3500_v45 }
 0xc0d   : > { %v3525_v19 = vld [vmem:[#allocation7 + $0x280] ss:$24 sps:$4 sm:$0xff]  }
 0xc0f   : > { %2027 = vmatpush1.bf16.msra.mxu0 %v3498_v47 }
 0xc10   : > { %2028 = vmatprep.subr.bf16.mxu0 %v3506_v49 }
 0xc13   : > { %2029 = vmatpush1.bf16.msra.mxu0 %v3504_v51 }
 0xc14   : > { %2030 = vmatprep.subr.bf16.mxu0 %v3512_v54 }
 0xc17   : > { %2031 = vmatpush1.bf16.msra.mxu0 %v3510_v56 }
 0xc18   : > { %2032 = vmatprep.subr.bf16.mxu0 %v3518_v58 }
 0xc1b   : > { %2033 = vmatpush1.bf16.msra.mxu0 %v3516_v60 }
 0xc1c   : > { %3201 = vmatprep.subr.bf16.mxu0 %v3796_v1 }
 0xc94   : > { %v1567_v6 = vpop.xlane.xlu1 %1566 }
 0xc95   : > { %v1568_v32 = vmul.f32 0.03125, %v1567_v6  ;;  %v3540_v6 = vld [vmem:[#allocation7 + $0x190] ss:$24 sps:$4 sm:$0xff]  }
 0xc97   : > { %v1569_v33 = vsub.f32 %v1565_v17, %v1568_v32  ;;  %v3522_v17 = vld [vmem:[#allocation7 + $0x2b0] ss:$24 sps:$4 sm:$0xff]  }
 0xc98   : > { %v1581_v32 = vld [vmem:[#allocation5 + $0x90] ss:$8 sm:$0xf] }
 0xc99   : > { %v1570_v34 = vmul.f32 %v3979_v31, %v1569_v33  ;;  %v1582_v33 = vld [vmem:[#allocation5 + $0x90] ss:$8 sm:$0x30] }
 0xc9b   : > { %v1571_v35 = vmul.f32 %v1570_v34, %v1570_v34 }
 0xc9d   : > { %1572 = vadd.xlane.f32.xlu1 %v1571_v35 }
 0xd26   : > { %v1573_v62 = vpop.xlane.xlu1 %1572 }
 0xd27   : > { %v1574_v63 = vmul.f32 0.03125, %v1573_v62 }
 0xd29   : > { %v1575_v2 = vadd.f32 1e-12, %v1574_v63 }
 0xd2b   : > { %3589 = vrsqrt.f32 %v1575_v2 }
 0xd38   : > { %v3590_v3 = vpop.eup %3589 }
 0xd39   : > { %v1577_v9 = vmul.f32 %v3590_v3, %v1570_v34  ;;  %v4076_v34 = vor.u32 %v1582_v33, %v1581_v32  ;;  %v3549_v32 = vld [vmem:[#allocation8 + $0x160] sm:$0xff]  }
 0xd3a   : > { %v3550_v33 = vld [vmem:[#allocation8 + $0x120] sm:$0xff]  }
 0xd3b   : > { %v1578_v12 = vmul.f32 %v1577_v9, %v512_v5  ;;  %v1718_v35 = vrot.slane %v4076_v34, %v638_v28  ;;  %v1710_v38 = vrot.slane %v4076_v34, %v630_v30  ;;  %v1722_v42 = vrot.slane %v4076_v34, %v642_v4 }
 0xd3c   : > { %v1714_v30 = vrot.slane %v4076_v34, %v634_v8  ;;  %v1726_v52 = vrot.slane %v4076_v34, %v646_v44 }
 0xd3d   : > { %v4066_v13 = vadd.f32 %v1578_v12, %v513_v10 }
 0xd3f   : > { %v1705_v15 = vpack.c.bf16 %v4066_v13, %v4066_v13 }
 0xd41   : > { %2010 = vmatmul.mubr.bf16.vlgmr.msra.gmra.mxu1 %v1705_v15  ;;  %2051 = vmatmul.mubr.bf16.vlgmr.msra.gmra.mxu0 %v1705_v15 }
 0xd42   : > { %2060 = vmatpush1.bf16.msra.mxu1 %v3519_v14  ;;  %2091 = vmatprep.mubr.bf16.mxu1 %v3795_v0  ;;  %v3539_v0 = vld [vmem:[#allocation7 + $0x1c4] ss:$24 sps:$4 sm:$0xff]  }
 0xd43   : > { %2061 = vmatprep.subr.bf16.mxu1 %v3524_v16  ;;  %3203 = vmatprep.mubr.msk.bf16.mxu0 %vm3797_vm0, %v3796_v1 }
 0xd46   : > { %2062 = vmatpush1.bf16.msra.mxu1 %v3522_v17 }
 0xd47   : > { %2063 = vmatprep.subr.bf16.mxu1 %v3527_v18 }
 0xd4a   : > { %2064 = vmatpush1.bf16.msra.mxu1 %v3525_v19 }
 0xd4b   : > { %2065 = vmatprep.subr.bf16.mxu1 %v3530_v20 }
 0xd4e   : > { %2066 = vmatpush1.bf16.msra.mxu1 %v3528_v21 }
 0xd4f   : > { %2067 = vmatprep.subr.bf16.mxu1 %v3533_v22 }
 0xd52   : > { %2068 = vmatpush1.bf16.msra.mxu1 %v3531_v23 }
 0xd53   : > { %2069 = vmatprep.subr.bf16.mxu1 %v3536_v25  ;;  %v3543_v25 = vld [vmem:[#allocation8 + $0x178] sm:$0xff]  }
 0xd56   : > { %2070 = vmatpush1.bf16.msra.mxu1 %v3534_v26  ;;  %v3544_v26 = vld [vmem:[#allocation8 + $0x138] sm:$0xff]  }
 0xd57   : > { %2071 = vmatprep.subr.bf16.mxu1 %v3539_v0  ;;  %v3545_v0 = vld [vmem:[#allocation8 + $0x170] sm:$0xff]  }
 0xd5a   : > { %2072 = vmatpush1.bf16.msra.mxu1 %v3537_v27  ;;  %v3546_v27 = vld [vmem:[#allocation8 + $0x130] sm:$0xff]  }
 0xd5b   : > { %2073 = vmatprep.subr.bf16.mxu1 %v3542_v29  ;;  %v3547_v29 = vld [vmem:[#allocation8 + $0x168] sm:$0xff]  }
 0xd5e   : > { %2074 = vmatpush1.bf16.msra.mxu1 %v3540_v6  ;;  %v3548_v6 = vld [vmem:[#allocation8 + $0x128] sm:$0xff]  }
 0xd5f   : > { %3207 = vmatprep.subr.bf16.mxu1 %v3796_v1 }
 0xd61   : > { %2092 = vmatmul.mubr.bf16.vlgmr.msra.gmra.mxu1 %v1705_v15 }
 0xd62   : > { %3209 = vmatprep.mubr.msk.bf16.mxu1 %vm3797_vm0, %v3796_v1 }
 0xe01   : > { %v2011_v36 = vpop.f32.mrf.mxu1  ;;  %v2052_v37 = vpop.f32.mrf.mxu0 }
 0xe02   : > { %v2053_v11 = vadd.f32 %v2052_v37, %v1718_v35  ;;  %v2012_v46 = vadd.f32 %v2011_v36, %v1710_v38  ;;  %v3551_v35 = vld [vmem:[#allocation8 + $0x158] sm:$0xff]  }
 0xe03   : > { %v2013_v39 = vpop.f32.mrf.mxu1  ;;  %v2054_v40 = vpop.f32.mrf.mxu0  ;;  %v3552_v36 = vld [vmem:[#allocation8 + $0x118] sm:$0xff]  }
 0xe04   : > { %v2101_v41 = vpack.c.bf16 %v2053_v11, %v2053_v11  ;;  %v2055_v48 = vadd.f32 %v2054_v40, %v1722_v42  ;;  %v2100_v49 = vpack.c.bf16 %v2012_v46, %v2012_v46  ;;  %v2014_v4 = vadd.f32 %v2013_v39, %v1714_v30  ;;  %v3558_v30 = vld [vmem:[#allocation8 + $0x100] sm:$0xff]  }
 0xe05   : > { %v2015_v43 = vpop.f32.mrf.mxu1  ;;  %v2056_v45 = vpop.f32.mrf.mxu0  ;;  %v1730_v11 = vrot.slane %v4076_v34, %v650_v7  ;;  %v3553_v34 = vld [vmem:[#allocation8 + $0x150] sm:$0xff]  }
 0xe06   : > { %3202 = vmatpush3.bf16.xpose.msra.mxu0 %v2101_v41  ;;  %v2202_v50 = vpack.c.bf16 %v2055_v48, %v2055_v48  ;;  %v2201_v51 = vpack.c.bf16 %v2014_v4, %v2014_v4  ;;  %v3556_v48 = vld [vmem:[#allocation8 + $0x108] sm:$0xff]  }
 0xe07   : > { %v2016_v47 = vpop.f32.mrf.mxu1  ;;  %v2057_v28 = vpop.f32.mrf.mxu0  ;;  %3213 = vmatprep.subr.bf16.mxu0 %v3796_v1 }
 0xe08   : > { %v3554_v47 = vld [vmem:[#allocation8 + $0x110] sm:$0xff]   ;;  %v3555_v28 = vld [vmem:[#allocation8 + $0x148] sm:$0xff]  }
 0xe0d   : > { %3204 = vmatmul.mubr.bf16.vlgmr.msra.gmra.mxu0 %v2100_v49  ;;  %v3557_v49 = vld [vmem:[#allocation8 + $0x140] sm:$0xff]  }
 0xe0e   : > { %3214 = vmatpush3.bf16.xpose.msra.mxu0 %v2202_v50  ;;  %3215 = vmatprep.mubr.msk.bf16.mxu0 %vm3797_vm0, %v3796_v1 }
 0xe0f   : > { %3077 = vmatprep.subr.bf16.mxu0 %v3543_v25 }
 0xe15   : > { %3216 = vmatmul.mubr.bf16.vlgmr.msra.gmra.mxu0 %v2201_v51 }
 0xe16   : > { %3078 = vmatpush3.bf16.msra.mxu0 %v3544_v26  ;;  %v1585_v26 = vld [vmem:[#allocation5 + $0x92] ss:$0 sm:$0xff] }
 0xe17   : > { %3079 = vmatprep.subr.bf16.mxu0 %v3545_v0 }
 0xe1a   : > { %3080 = vmatpush3.bf16.msra.mxu0 %v3546_v27  ;;  %v1586_v27 = vld [vmem:[#allocation5 + $0x93] ss:$0 sm:$0xff] }
 0xe1b   : > { %3081 = vmatprep.subr.bf16.mxu0 %v3547_v29 }
 0xe1e   : > { %3082 = vmatpush3.bf16.msra.mxu0 %v3548_v6 }
 0xe1f   : > { %3083 = vmatprep.subr.bf16.mxu0 %v3549_v32 }
 0xe21   : > { %v2093_v54 = vpop.f32.mrf.mxu1 }
 0xe22   : > { %v2094_v55 = vadd.f32 %v2093_v54, %v1726_v52  ;;  %3084 = vmatpush3.bf16.msra.mxu0 %v3550_v33  ;;  %v3567_v33 = vld [vmem:[#allocation8 + $0x1f8] sm:$0xff]  }
 0xe23   : > { %v2095_v56 = vpop.f32.mrf.mxu1  ;;  %3085 = vmatprep.subr.bf16.mxu0 %v3551_v35  ;;  %v3568_v35 = vld [vmem:[#allocation8 + $0x1f0] sm:$0xff]  }
 0xe24   : > { %v2102_v57 = vpack.c.bf16 %v2094_v55, %v2094_v55  ;;  %v2096_v39 = vadd.f32 %v2095_v56, %v1730_v11  ;;  %v3571_v11 = vld [vmem:[#allocation8 + $0x1d8] sm:$0xff]  }
 0xe25   : > { %v2097_v58 = vpop.f32.mrf.mxu1 }
 0xe26   : > { %v2159_v8 = vsel %vm1080_vm4, %v2102_v57, 0  ;;  %3086 = vmatpush3.bf16.msra.mxu0 %v3552_v36  ;;  %v2203_v41 = vpack.c.bf16 %v2096_v39, %v2096_v39  ;;  %v3569_v36 = vld [vmem:[#allocation8 + $0x1e8] sm:$0xff]  }
 0xe27   : > { %v2098_v59 = vpop.f32.mrf.mxu1  ;;  %3208 = vmatpush3.bf16.msra.mxu1 %v2159_v8  ;;  %3087 = vmatprep.subr.bf16.mxu0 %v3553_v34  ;;  %v3573_v39 = vld [vmem:[#allocation8 + $0x1c8] sm:$0xff]  }
 0xe28   : > { %3219 = vmatprep.subr.bf16.mxu1 %v3796_v1  ;;  %v2260_v45 = vsel %vm1080_vm4, %v2203_v41, 0  ;;  %v1587_v41 = vld [vmem:[#allocation5 + $0x94] ss:$0 sm:$0xff] }
 0xe2a   : > { %3088 = vmatpush3.bf16.msra.mxu0 %v3554_v47 }
 0xe2b   : > { %3089 = vmatprep.subr.bf16.mxu0 %v3555_v28 }
 0xe2e   : > { %3090 = vmatpush3.bf16.msra.mxu0 %v3556_v48 }
 0xe2f   : > { %3091 = vmatprep.subr.bf16.mxu0 %v3557_v49 }
 0xe32   : > { %3092 = vmatpush3.bf16.msra.mxu0 %v3558_v30 }
 0xe33   : > { %3245 = vmatprep.subr.bf16.mxu0 %v3796_v1 }
 0xecd   : > { %v2137_v60 = vpop.f32.mrf.mxu0 }
 0xece   : > { %v2138_v61 = vadd.f32 %v2137_v60, %v4011_v53  ;;  %v1584_v60 = vld [vmem:[#allocation5 + $0x91] ss:$0 sm:$0xff] }
 0xecf   : > { %v3205_v62 = vpop.f32.mrf.mxu0 }
 0xed0   : > { %v2143_v63 = vsel %vm1064_vm5, %v2138_v61, -inf }
 0xed1   : > { %2144 = vmax.xlane.f32.xlu0 %v2143_v63  ;;  %v2140_v2 = vpop.f32.mrf.mxu0 }
 0xed3   : > { %v3206_v44 = vpop.f32.mrf.mxu0 }
 0xed5   : > { %v2238_v3 = vpop.f32.mrf.mxu0 }
 0xed6   : > { %v2239_v5 = vadd.f32 %v2238_v3, %v4011_v53 }
 0xed7   : > { %v3217_v9 = vpop.f32.mrf.mxu0 }
 0xed8   : > { %v2244_v10 = vsel %vm1064_vm5, %v2239_v5, -inf  ;;  %v3560_v9 = vld [vmem:[#allocation8 + $0x1b0] sm:$0xff]  }
 0xed9   : > { %2245 = vmax.xlane.f32.xlu1 %v2244_v10  ;;  %v2241_v12 = vpop.f32.mrf.mxu0 }
 0xedb   : > { %v3218_v14 = vpop.f32.mrf.mxu0 }
 0xf5a   : > { %v2145_v15 = vpop.xlane.xlu0 %2144 }
 0xf5b   : > { %v2146_v16 = vsub.f32 %v2138_v61, %v2145_v15 }
 0xf5d   : > { %v2147_v17 = vmul.f32 1.442695, %v2146_v16 }
 0xf5f   : > { %3591 = vpow2.f32 %v2147_v17  ;;  %v3561_v17 = vld [vmem:[#allocation8 + $0x1a8] sm:$0xff]  }
 0xf62   : > { %v2246_v18 = vpop.xlane.xlu1 %2245 }
 0xf63   : > { %v2247_v19 = vsub.f32 %v2239_v5, %v2246_v18  ;;  %v3559_v5 = vld [vmem:[#allocation8 + $0x1b8] sm:$0xff]   ;;  %v3562_v18 = vld [vmem:[#allocation8 + $0x1a0] sm:$0xff]  }
 0xf65   : > { %v2248_v20 = vmul.f32 1.442695, %v2247_v19  ;;  %v3564_v19 = vld [vmem:[#allocation8 + $0x190] sm:$0xff]  }
 0xf67   : > { %3593 = vpow2.f32 %v2248_v20  ;;  %v3565_v20 = vld [vmem:[#allocation8 + $0x188] sm:$0xff]  }
 0xf6c   : > { %v3592_v21 = vpop.eup %3591 }
 0xf6d   : > { %v2149_v22 = vsel %vm1064_vm5, %v3592_v21, 0.0 }
 0xf6e   : > { %2150 = vadd.xlane.f32.xlu0 %v2149_v22 }
 0xf74   : > { %v3594_v23 = vpop.eup %3593 }
 0xf75   : > { %v2250_v53 = vsel %vm1064_vm5, %v3594_v23, 0.0 }
 0xf76   : > { %2251 = vadd.xlane.f32.xlu1 %v2250_v53 }
 0xff7   : > { %v2151_v37 = vpop.xlane.xlu0 %2150 }
 0xff8   : > { %3595 = vrcp.f32 %v2151_v37  ;;  %v3570_v37 = vld [vmem:[#allocation8 + $0x1e0] sm:$0xff]  }
 0xfff   : > { %v2252_v38 = vpop.xlane.xlu1 %2251 }
0x1000   : > { %3597 = vrcp.f32 %v2252_v38  ;;  %v3572_v38 = vld [vmem:[#allocation8 + $0x1d0] sm:$0xff]  }
0x1005   : > { %v3596_v40 = vpop.eup %3595 }
0x1006   : > { %v2153_v42 = vmul.f32 %v3596_v40, %v3592_v21  ;;  %v3566_v21 = vld [vmem:[#allocation8 + $0x180] sm:$0xff]  }
0x1007   : > { %v3574_v40 = vld [vmem:[#allocation8 + $0x1c0] sm:$0xff]  }
0x1008   : > { %v2154_v43 = vpack.c.bf16 %v2153_v42, %v2153_v42 }
0x100a   : > { %3210 = vmatmul.mubr.msk.bf16.vlgmr.msra.gmra.mxu1 %vm1064_vm5, %v2154_v43 }
0x100b   : > { %3220 = vmatpush3.bf16.msra.mxu1 %v2260_v45  ;;  %3221 = vmatprep.mubr.msk.bf16.mxu1 %vm3797_vm0, %v3796_v1 }
0x100c   : > { %3225 = vmatprep.subr.bf16.mxu1 %v3796_v1 }
0x100d   : > { %v3598_v24 = vpop.eup %3597 }
0x100e   : > { %v2254_v46 = vmul.f32 %v3598_v24, %v3594_v23 }
0x1010   : > { %v2255_v7 = vpack.c.bf16 %v2254_v46, %v2254_v46 }
0x1012   : > { %3222 = vmatmul.mubr.msk.bf16.vlgmr.msra.gmra.mxu1 %vm1064_vm5, %v2255_v7 }
0x1013   : > { %3241 = vmatprep.mubr.msk.bf16.mxu1 %vm3797_vm0, %v3796_v1  ;;  %3226 = vmatpush3.bf16.msra.mxu1 %v3559_v5 }
0x1014   : > { %3227 = vmatprep.subr.bf16.mxu1 %v3796_v1 }
0x1017   : > { %3228 = vmatpush3.bf16.msra.mxu1 %v3560_v9 }
0x1018   : > { %3229 = vmatprep.subr.bf16.mxu1 %v3796_v1 }
0x101b   : > { %3230 = vmatpush3.bf16.msra.mxu1 %v3561_v17 }
0x101c   : > { %3231 = vmatprep.subr.bf16.mxu1 %v3796_v1 }
0x101f   : > { %3232 = vmatpush3.bf16.msra.mxu1 %v3562_v18 }
0x1020   : > { %3233 = vmatprep.subr.bf16.mxu1 %v3796_v1 }
0x10ca   : > { %v2195_v50 = vpop.f32.mrf.mxu1 }
0x10cb   : > { %v2302_v56 = vpack.c.bf16 %v2195_v50, %v2195_v50 }
0x10cc   : > { %v3211_v4 = vpop.f32.mrf.mxu1 }
0x10ce   : > { %v2198_v51 = vpop.f32.mrf.mxu1 }
0x10d0   : > { %v3212_v52 = vpop.f32.mrf.mxu1 }
0x10d2   : > { %v2296_v54 = vpop.f32.mrf.mxu1 }
0x10d3   : > { %v2303_v55 = vpack.c.bf16 %v2296_v54, %v2296_v54  ;;  %v1588_v54 = vld [vmem:[#allocation5 + $0x95] ss:$0 sm:$0xff] }
0x10d4   : > { %v3223_v57 = vpop.f32.mrf.mxu1 }
0x10d5   : > { %2432 = vmatprep.mubr.bf16.mxu0 %v2303_v55 }
0x10d6   : > { %v2299_v58 = vpop.f32.mrf.mxu1  ;;  %2433 = vmatmul.mubr.bf16.vlgmr.msra.gmra.mxu0 %v2302_v56 }
0x10d7   : > { %3261 = vmatprep.mubr.msk.bf16.mxu0 %vm3797_vm0, %v3796_v1  ;;  %3246 = vmatpush3.bf16.msra.mxu0 %v3567_v33 }
0x10d8   : > { %v3224_v8 = vpop.f32.mrf.mxu1  ;;  %3247 = vmatprep.subr.bf16.mxu0 %v3796_v1 }
0x10db   : > { %3248 = vmatpush3.bf16.msra.mxu0 %v3568_v35 }
0x10dc   : > { %3249 = vmatprep.subr.bf16.mxu0 %v3796_v1 }
0x10df   : > { %3250 = vmatpush3.bf16.msra.mxu0 %v3569_v36 }
0x10e0   : > { %3251 = vmatprep.subr.bf16.mxu0 %v3796_v1 }
0x10e3   : > { %3252 = vmatpush3.bf16.msra.mxu0 %v3570_v37 }
0x10e4   : > { %3253 = vmatprep.subr.bf16.mxu0 %v3796_v1 }
0x10e7   : > { %3254 = vmatpush3.bf16.msra.mxu0 %v3571_v11 }
0x10e8   : > { %3255 = vmatprep.subr.bf16.mxu0 %v3796_v1 }
0x10eb   : > { %3256 = vmatpush3.bf16.msra.mxu0 %v3572_v38 }
0x10ec   : > { %3257 = vmatprep.subr.bf16.mxu0 %v3796_v1 }
0x10ef   : > { %3258 = vmatpush3.bf16.msra.mxu0 %v3573_v39 }
0x10f0   : > { %3259 = vmatprep.subr.bf16.mxu0 %v3796_v1 }
0x10f3   : > { %3260 = vmatpush3.bf16.msra.mxu0 %v3574_v40 }
0x1196   : > { %v3093_v59 = vpop.f32.mrf.mxu0 }
0x1198   : > { %v3094_v61 = vpop.f32.mrf.mxu0 }
0x1199   : > { %v3095_v62 = vadd.f32 %v3094_v61, %v3093_v59 }
0x119a   : > { %v3096_v63 = vpop.f32.mrf.mxu0 }
0x119b   : > { %v2435_v2 = vadd.f32 %v3095_v62, %v1584_v60 }
0x119c   : > { %v3097_v44 = vpop.f32.mrf.mxu0 }
0x119d   : > { %v2440_v3 = vadd.f32 %v2435_v2, %v4066_v13  ;;  %v3563_v13 = vld [vmem:[#allocation8 + $0x198] sm:$0xff]  }
0x119e   : > { %3234 = vmatpush3.bf16.msra.mxu1 %v3563_v13 }
0x119f   : > { %2441 = vadd.xlane.f32.xlu0 %v2440_v3  ;;  %3235 = vmatprep.subr.bf16.mxu1 %v3796_v1 }
0x11a2   : > { %3236 = vmatpush3.bf16.msra.mxu1 %v3564_v19  ;;  %v1589_v19 = vld [vmem:[#allocation5 + $0x96] ss:$0 sm:$0xff] }
0x11a3   : > { %3237 = vmatprep.subr.bf16.mxu1 %v3796_v1 }
0x11a6   : > { %3238 = vmatpush3.bf16.msra.mxu1 %v3565_v20 }
0x11a7   : > { %3239 = vmatprep.subr.bf16.mxu1 %v3796_v1  ;;  %v374_v1 = vld [vmem:[%s365_s14] sm:$0xff] }
0x11a8   : > { %v2670_v52 = vsel %vm2669_vm6, %v374_v1, 0.0 }
0x11aa   : > { %3240 = vmatpush3.bf16.msra.mxu1 %v3566_v21  ;;  %v1590_v21 = vld [vmem:[#allocation5 + $0x97] ss:$0 sm:$0xff] }
0x1228   : > { %v2442_v10 = vpop.xlane.xlu0 %2441 }
0x1229   : > { %v2443_v12 = vmul.f32 0.03125, %v2442_v10 }
0x122b   : > { %v2444_v14 = vsub.f32 %v2440_v3, %v2443_v12 }
0x122d   : > { %v2445_v15 = vmul.f32 %v3979_v31, %v2444_v14 }
0x122f   : > { %v2446_v16 = vmul.f32 %v2445_v15, %v2445_v15 }
0x1231   : > { %2447 = vadd.xlane.f32.xlu1 %v2446_v16 }
0x1235   : > { %2671 = vadd.xlane.f32.xlu1 %v2670_v52 }
0x1246   : > { %2659 = vperm.xlu1 %3358, %v374_v1  }
0x12ba   : > { %v2448_v22 = vpop.xlane.xlu1 %2447 }
0x12bb   : > { %v2449_v23 = vmul.f32 0.03125, %v2448_v22 }
0x12bd   : > { %v2450_v53 = vadd.f32 1e-12, %v2449_v23 }
0x12be   : > { %v2672_v60 = vpop.xlane.xlu1 %2671 }
0x12bf   : > { %3599 = vrsqrt.f32 %v2450_v53  ;;  %v2673_v61 = vrot.slane %v2672_v60, 4 }
0x12c1   : > { %v2674_v62 = vadd.f32 %v2673_v61, %v2672_v60 }
0x12c2   : > { %v2660_v53 = vpop.permute.xlu1 %2659 }
0x12c3   : > { %v2675_v63 = vrot.slane %v2674_v62, 2 }
0x12c5   : > { %v2676_v2 = vadd.f32 %v2675_v63, %v2674_v62 }
0x12c7   : > { %v2677_v44 = vrot.slane %v2676_v2, 1 }
0x12c9   : > { %v2678_v3 = vadd.f32 %v2677_v44, %v2676_v2 }
0x12cb   : > { %3265 = vpush %v2678_v3 }
0x12cc   : > { %v3600_v25 = vpop.eup %3599 }
0x12cd   : > { %v2452_v0 = vmul.f32 %v3600_v25, %v2445_v15 }
0x12cf   : > { %v2453_v29 = vmul.f32 %v2452_v0, %v1585_v26 }
0x12d1   : > { %v2454_v6 = vadd.f32 %v2453_v29, %v1586_v27 }
0x12d3   : > { %v2455_v32 = vpack.c.bf16 %v2454_v6, %v2454_v6 }
0x12d5   : > { %3242 = vmatmul.mubr.bf16.vlgmr.msra.gmra.mxu1 %v2455_v32 }
0x12fc   : > { %s3266_s15 = spop %3265 }
0x12fd   : > { %v2680_v13 = vstv %s3266_s15 }
0x12fe   : > { %v2681_v22 = vmax.f32 %v2680_v13, 1e-09 }
0x1395   : > { %v2538_v42 = vpop.f32.mrf.mxu1 }
0x1396   : > { %v2539_v43 = vadd.f32 %v2538_v42, %v1587_v41 }
0x1397   : > { %v3243_v45 = vpop.f32.mrf.mxu1 }
0x1398   : > { %v2544_v24 = vmul.f32 %v2539_v43, %v2539_v43 }
0x1399   : > { %v2541_v46 = vpop.f32.mrf.mxu1 }
0x139a   : > { %v2545_v7 = vmul.f32 %v2544_v24, %v2539_v43 }
0x139b   : > { %v3244_v34 = vpop.f32.mrf.mxu1 }
0x139c   : > { %v2546_v47 = vmul.f32 0.044715, %v2545_v7 }
0x139e   : > { %v2547_v28 = vadd.f32 %v2546_v47, %v2539_v43 }
0x13a0   : > { %v2548_v48 = vmul.f32 0.7978846, %v2547_v28 }
0x13a2   : > { %3601 = vtanh.f32 %v2548_v48 }
0x13af   : > { %v3602_v49 = vpop.eup %3601 }
0x13b0   : > { %v2550_v30 = vadd.f32 1.0, %v3602_v49 }
0x13b2   : > { %v2551_v50 = vmul.f32 0.5, %v2550_v30 }
0x13b4   : > { %v2552_v4 = vmul.f32 %v2551_v50, %v2539_v43 }
0x13b6   : > { %v2553_v51 = vpack.c.bf16 %v2552_v4, %v2552_v4 }
0x13b8   : > { %3262 = vmatmul.mubr.bf16.vlgmr.msra.gmra.mxu0 %v2553_v51 }
0x1478   : > { %v2636_v55 = vpop.f32.mrf.mxu0 }
0x1479   : > { %v2637_v56 = vadd.f32 %v2636_v55, %v1588_v54 }
0x147a   : > { %v3263_v57 = vpop.f32.mrf.mxu0 }
0x147b   : > { %v2642_v58 = vadd.f32 %v2637_v56, %v2454_v6 }
0x147c   : > { %v2639_v8 = vpop.f32.mrf.mxu0 }
0x147d   : > { %2643 = vadd.xlane.f32.xlu0 %v2642_v58 }
0x147e   : > { %v3264_v59 = vpop.f32.mrf.mxu0 }
0x1506   : > { %v2644_v5 = vpop.xlane.xlu0 %2643 }
0x1507   : > { %v2645_v9 = vmul.f32 0.03125, %v2644_v5 }
0x1509   : > { %v2646_v10 = vsub.f32 %v2642_v58, %v2645_v9 }
0x150b   : > { %v2647_v12 = vmul.f32 %v3979_v31, %v2646_v10 }
0x150d   : > { %v2648_v14 = vmul.f32 %v2647_v12, %v2647_v12 }
0x150f   : > { %2649 = vadd.xlane.f32.xlu0 %v2648_v14 }
0x1598   : > { %v2650_v15 = vpop.xlane.xlu0 %2649 }
0x1599   : > { %v2651_v16 = vmul.f32 0.03125, %v2650_v15 }
0x159b   : > { %v2652_v17 = vadd.f32 1e-12, %v2651_v16 }
0x159d   : > { %3603 = vrsqrt.f32 %v2652_v17 }
0x159e   : > { %3605 = vrcp.f32 %v2681_v22 }
0x15aa   : > { %v3604_v18 = vpop.eup %3603 }
0x15ab   : > { %v2654_v20 = vmul.f32 %v3604_v18, %v2647_v12  ;;  %v3606_v33 = vpop.eup %3605 }
0x15ad   : > { %v2655_v23 = vmul.f32 %v2654_v20, %v1589_v19 }
0x15af   : > { %v2656_v25 = vadd.f32 %v2655_v23, %v1590_v21 }
0x15b1   : > { %v2662_v31 = vmul.f32 %v2660_v53, %v2656_v25 }
0x15b3   : > { %v2663_v26 = vrot.slane %v2662_v31, 4 }
0x15b5   : > { %v2664_v0 = vadd.f32 %v2663_v26, %v2662_v31 }
0x15b7   : > { %v2665_v27 = vrot.slane %v2664_v0, 2 }
0x15b9   : > { %v2666_v29 = vadd.f32 %v2665_v27, %v2664_v0 }
0x15bb   : > { %v2667_v6 = vrot.slane %v2666_v29, 1 }
0x15bd   : > { %v2668_v32 = vadd.f32 %v2667_v6, %v2666_v29 }
0x15bf   : > { %v2683_v35 = vmul.f32 %v3606_v33, %v2668_v32 }
0x15c1   : > { %2684 = vst [vmem:[%s353_s13] sm:$0x1] %v2683_v35 }
0x15c2   : > { %3724 = shalt.err (!%p3721_p13)
}
0x15c3   : > { %s3725_s29 = scalar_lea.hbm %s2696_s20, 16  ;;  %s3729_s17 = scalar_lea.hbm %s4180_s7, 32 }
0x15c4   : > { %p3726_p8 = scmp.ne.s32.totalorder %s2696_s20, %s3725_s29  ;;  %p3730_p1 = scmp.lt.s32.totalorder %s2696_s20, %s4180_s7 }
0x15c5   : > { %p3731_p12 = scmp.lt.s32.totalorder %s3729_s17, %s3725_s29 }
0x15c6   : > { %p3727_p11 = pnand %p3726_p8, %p3878_p5 }
0x15c7   : > { %p3732_p10 = por %p3731_p12, %p3730_p1 }
0x15c8   : > { %p3728_p0 = pneg %p3727_p11 }
0x15ca   : > { %p3733_p3 = pnand %p3732_p10, %p3728_p0 }
0x15cc   : > { %3736 = shalt.err (!%p3733_p3)
}
0x15cd   : > { %3283 = dma.vmem_to_hbm [thread:$0]  (%p3878_p5), %s2699_s16, 16, %s2696_s20, %s2686_s21  }
0x15ce PF: > { %p3310_p2 = scmp.ge.s32.totalorder %s3783_s27, 2  ;;  %s2710_s8 = sand.u32 1, %s3771_s24  }
0x15cf   : > { %p4192_p4 = scmp.ne.s32.totalorder %s4183_s12, 0  ;;  %s2711_s9 = scalar_lea.sflag [#allocation4], %s2710_s8 }
0x15d1   : > { %p3299_p6 = pnand %p3310_p2, %p4192_p4 }
0x15d3   : > { %p3300_p9 = pneg %p3299_p6 }
0x15d5   : > { %3766 = dma.done.wait (%p3300_p9), %s2711_s9, 16  }
0x15d6   : > { %3768 = vsyncadd (%p3300_p9), %s2711_s9, 4294967280  ;;  %p20_p7 = scmp.ge.s32.totalorder %s3865_s30, 4   ;;  %s4193_s24 = smov %s3775_s25 }
0x15d7   : > { %s4194_s25 = smov %s3779_s26  ;;  %s4195_s26 = smov %s3876_s10 }
0x15d8   : > { %s4196_s27 = smov %s3865_s30  ;;  %22 = sbr.rel (!%p20_p7) target bundleno = 6 (0x6), region = 110 }
0x15dd   :  { %2715 = vsyncpa [#allocation3], 1 }
0x15de   :  { %2717 = vsyncpa [#allocation3 + $0x1], 1 }
0x15df   :  { %2718 = vsyncpa [#allocation6], 1 }
0x15e0   :  { %2719 = vsyncpa [#allocation9], 1 }
0x15e1   :  { %2720 = vsyncpa [#allocation4], 1 }
0x15e2   :  { %2722 = vsyncpa [#allocation4 + $0x1], 1 }

</bundles_post_ra>
